<compile_context>
chip_gen: v5e
topology: v5e:2x2
jax: 0.10.0
libtpu: 0.0.40
codegen_flags: <defaults>
</compile_context>

<pallas_src>
import functools
import math

import jax
import jax.numpy as jnp
import numpy as np
from jax.experimental import pallas as pl
from jax.experimental.pallas import tpu as pltpu


# ----------------------------- shared math helpers -----------------------------

_LN_EPS = 1e-5


def _gelu(x):
    # TODO(synk): tanh-approx GELU; switch to erf if exact parity with nn.GELU needed.
    c = math.sqrt(2.0 / math.pi)
    return 0.5 * x * (1.0 + jnp.tanh(c * (x + 0.044715 * x * x * x)))


def _layer_norm(x, gamma, beta):
    mean = jnp.mean(x, axis=-1, keepdims=True)
    var = jnp.mean((x - mean) * (x - mean), axis=-1, keepdims=True)
    inv = jax.lax.rsqrt(var + _LN_EPS)
    return (x - mean) * inv * gamma + beta


def sawtooth_positional_encoding(max_len, dim):
    # TODO(synk): SawtoothPositionalEncoder source not provided; deterministic sawtooth
    # analog of sinusoidal PE (same geometric wavelengths).
    pos = jnp.arange(max_len, dtype=jnp.float32)[:, None]        # (L, 1)
    d = jnp.arange(dim, dtype=jnp.float32)[None, :]              # (1, D)
    period = jnp.power(10000.0, (2.0 * jnp.floor(d / 2.0)) / dim)
    phase = jnp.where(jnp.mod(d, 2.0) == 0.0, 0.0, 0.5)
    frac = jnp.mod(pos / period + phase, 1.0)
    return (2.0 * frac - 1.0).astype(jnp.float32)                # (L, D) in [-1, 1)


# --------------------------- per-layer compute (shared) --------------------------

def _encoder_layer(x, mask, num_heads, B, S, E,
                   wqkv, bqkv, wo, bo, g1, be1, w1, b1, w2, b2, g2, be2):
    """One post-LN encoder layer.  x: (B*S, E) f32 -> (B*S, E) f32.

    1/sqrt(dh) is pre-folded into wq/bq (stack_params), so no score scaling here.
    Matmul operands are bf16, accumulation f32; LN / softmax / GELU stay f32.
    """
    dh = E // num_heads

    # Fused QKV projection: one (B*S, E) @ (E, 3E) matmul.
    qkv = jnp.dot(x.astype(jnp.bfloat16), wqkv,
                  preferred_element_type=jnp.float32) + bqkv          # (B*S, 3E) f32
    qkv = qkv.astype(jnp.bfloat16)                                    # single cast

    # Multi-head bidirectional self-attention (key-padding masked).
    # Head outputs stay in vregs; no VMEM scratch slab / masked partial stores.
    heads = []
    for h in range(num_heads):                                        # static unroll
        c = h * dh
        qh = qkv[:, c:c + dh].reshape(B, S, dh)
        kh = qkv[:, E + c:E + c + dh].reshape(B, S, dh)
        vh = qkv[:, 2 * E + c:2 * E + c + dh].reshape(B, S, dh)
        s = jnp.einsum("bqd,bkd->bqk", qh, kh,
                       preferred_element_type=jnp.float32) + mask     # (B, S, S)
        s = s - jnp.max(s, axis=-1, keepdims=True)
        p = jnp.exp(s)
        p = p * pl.reciprocal(jnp.sum(p, axis=-1, keepdims=True), approx=True)
        heads.append(jnp.einsum("bqk,bkd->bqd", p.astype(jnp.bfloat16), vh,
                                preferred_element_type=jnp.float32))  # (B, S, dh)
    attn_in = jnp.concatenate(heads, axis=-1).reshape(B * S, E)       # vreg concat

    attn = jnp.dot(attn_in.astype(jnp.bfloat16), wo,
                   preferred_element_type=jnp.float32) + bo
    # (attention dropout is identity at inference)
    h1 = _layer_norm(x + attn, g1, be1)

    # Feed-forward (GELU).
    f = jnp.dot(h1.astype(jnp.bfloat16), w1,
                preferred_element_type=jnp.float32) + b1
    f = _gelu(f)
    f = jnp.dot(f.astype(jnp.bfloat16), w2,
                preferred_element_type=jnp.float32) + b2
    # (feedforward dropout is identity at inference)
    return _layer_norm(h1 + f, g2, be2)


# --------------------------------- Pallas kernels --------------------------------

def _fused_all_layers_kernel(num_heads, num_layers, B, S, E,
                             x_ref, pe_ref, mask_ref,
                             wqkv_ref, bqkv_ref, wo_ref, bo_ref,
                             g1_ref, be1_ref, w1_ref, b1_ref, w2_ref, b2_ref,
                             g2_ref, be2_ref,
                             o_ref):
    """Small-model path: no grid, all layers' weights resident, static layer loop."""
    x = x_ref[...] + pe_ref[...]                                      # (B*S, E) f32
    mask = mask_ref[...]                                              # (B, 1, S)
    for l in range(num_layers):                                       # static unroll
        x = _encoder_layer(x, mask, num_heads, B, S, E,
                           wqkv_ref[l], bqkv_ref[l], wo_ref[l], bo_ref[l],
                           g1_ref[l], be1_ref[l], w1_ref[l], b1_ref[l],
                           w2_ref[l], b2_ref[l], g2_ref[l], be2_ref[l])
    o_ref[...] = x.astype(o_ref.dtype)


def _layer_grid_kernel(num_heads, B, S, E,
                       x_ref, pe_ref, mask_ref,
                       wqkv_ref, bqkv_ref, wo_ref, bo_ref,
                       g1_ref, be1_ref, w1_ref, b1_ref, w2_ref, b2_ref,
                       g2_ref, be2_ref,
                       o_ref):
    """Production path: one layer per grid step; o_ref (constant index_map, resident
    in VMEM) doubles as the activation carry; layer-(l+1) weights are double-buffered
    behind layer-l compute by BlockSpec pipelining."""
    l = pl.program_id(0)

    @pl.when(l == 0)
    def _():
        o_ref[...] = x_ref[...] + pe_ref[...]                         # fused PE add

    x = o_ref[...]                                                    # (B*S, E) f32
    mask = mask_ref[...]                                              # (B, 1, S)
    o_ref[...] = _encoder_layer(
        x, mask, num_heads, B, S, E,
        wqkv_ref[...], bqkv_ref[...], wo_ref[...], bo_ref[...],
        g1_ref[...], be1_ref[...], w1_ref[...], b1_ref[...],
        w2_ref[...], b2_ref[...], g2_ref[...], be2_ref[...]).astype(o_ref.dtype)


# ------------------------------- pallas_call wrapper -----------------------------

_WEIGHT_NAMES = ("wqkv", "bqkv", "wo", "bo", "ln1_g", "ln1_b",
                 "w1", "b1", "w2", "b2", "ln2_g", "ln2_b")

# Scoped VMEM budget: safe on v7x (64 MiB physical); raise toward ~100 MiB on
# v5e/v6e for production E/F if weight double-buffering needs it.
_VMEM_LIMIT_BYTES = 64 * 1024 * 1024
# Below this total stacked-weight size, drop the per-layer grid entirely.
_FUSE_ALL_LAYERS_BYTES = 8 * 1024 * 1024


def bidirectional_sequence_transformer(embeddings, ignore_mask, stacked, pe_table,
                                       num_heads, *, force_layer_grid=False):
    """embeddings: (B, S, E) f32; ignore_mask: (B, S) bool (True = ignore) or None."""
    B, S, E = embeddings.shape
    L = stacked["wqkv"].shape[0]
    F = stacked["w1"].shape[-1]
    M = B * S

    # Lane-dense 2-D activation slab; reshapes here are metadata-only / tiny.
    x2d = embeddings.reshape(M, E)
    pe2d = jnp.broadcast_to(pe_table[:S][None], (B, S, E)).reshape(M, E)
    if ignore_mask is None:
        mask_bias = jnp.zeros((B, 1, S), jnp.float32)
    else:
        mask_bias = jnp.where(ignore_mask, -1e9, 0.0).astype(jnp.float32).reshape(B, 1, S)

    weights = [stacked[n] for n in _WEIGHT_NAMES]
    weight_bytes = sum(int(np.prod(w.shape)) * w.dtype.itemsize for w in weights)
    fuse_all = (not force_layer_grid) and weight_bytes <= _FUSE_ALL_LAYERS_BYTES

    out2d_shape = jax.ShapeDtypeStruct((M, E), embeddings.dtype)

    if fuse_all:
        kernel = functools.partial(_fused_all_layers_kernel, num_heads, L, B, S, E)
        out2d = pl.pallas_call(
            kernel,
            out_shape=out2d_shape,
            compiler_params=pltpu.CompilerParams(
                vmem_limit_bytes=_VMEM_LIMIT_BYTES),
        )(x2d, pe2d, mask_bias, *weights)
    else:
        def per_layer(*dims):
            # Leading L axis squeezed; grid position selects the layer's slab.
            return pl.BlockSpec((None,) + dims, lambda l: (l,) + (0,) * len(dims))

        in_specs = [
            pl.BlockSpec((M, E), lambda l: (0, 0)),          # embeddings (layer-invariant)
            pl.BlockSpec((M, E), lambda l: (0, 0)),          # positional table (pre-broadcast)
            pl.BlockSpec((B, 1, S), lambda l: (0, 0, 0)),    # additive key-padding bias
            per_layer(E, 3 * E), per_layer(1, 3 * E),        # Wqkv (bf16, q pre-scaled), bqkv
            per_layer(E, E), per_layer(1, E),                # Wo (bf16), bo
            per_layer(1, E), per_layer(1, E),                # LN1 gamma, beta
            per_layer(E, F), per_layer(1, F),                # W1 (bf16), b1
            per_layer(F, E), per_layer(1, E),                # W2 (bf16), b2
            per_layer(1, E), per_layer(1, E),                # LN2 gamma, beta
        ]
        kernel = functools.partial(_layer_grid_kernel, num_heads, B, S, E)
        out2d = pl.pallas_call(
            kernel,
            out_shape=out2d_shape,
            grid_spec=pltpu.PrefetchScalarGridSpec(
                num_scalar_prefetch=0,
                grid=(L,),                                   # one grid step per layer
                in_specs=in_specs,
                out_specs=pl.BlockSpec((M, E), lambda l: (0, 0)),  # resident carry
            ),
            compiler_params=pltpu.CompilerParams(
                dimension_semantics=("arbitrary",),          # sequential layer carry
                vmem_limit_bytes=_VMEM_LIMIT_BYTES),
        )(x2d, pe2d, mask_bias, *weights)

    return out2d.reshape(B, S, E)


# ------------------------------- parameters & reference --------------------------

def init_params(key, num_layers, E, F):
    layers = []
    for i in range(num_layers):
        k = jax.random.fold_in(key, i)
        ks = jax.random.split(k, 12)

        def w(kk, shape):
            return 0.02 * jax.random.normal(kk, shape, jnp.float32)

        layers.append(dict(
            wq=w(ks[0], (E, E)), bq=w(ks[1], (1, E)),
            wk=w(ks[2], (E, E)), bk=w(ks[3], (1, E)),
            wv=w(ks[4], (E, E)), bv=w(ks[5], (1, E)),
            wo=w(ks[6], (E, E)), bo=w(ks[7], (1, E)),
            ln1_g=jnp.ones((1, E), jnp.float32), ln1_b=jnp.zeros((1, E), jnp.float32),
            w1=w(ks[8], (E, F)), b1=w(ks[9], (1, F)),
            w2=w(ks[10], (F, E)), b2=w(ks[11], (1, E)),
            ln2_g=jnp.ones((1, E), jnp.float32), ln2_b=jnp.zeros((1, E), jnp.float32),
        ))
    return layers


def stack_params(layers, num_heads):
    """Stack per-layer params along a leading L axis (weights bf16, rest f32).

    Folds the attention 1/sqrt(dh) scaling into Wq / bq so the kernel never scales
    the (B, S, S) score tensor.
    """
    E = layers[0]["wq"].shape[0]
    dh = E // num_heads
    scale = 1.0 / math.sqrt(dh)

    def stack(name, dtype):
        return jnp.stack([p[name] for p in layers]).astype(dtype)

    wqkv = jnp.stack([jnp.concatenate([p["wq"] * scale, p["wk"], p["wv"]], axis=1)
                      for p in layers])
    bqkv = jnp.stack([jnp.concatenate([p["bq"] * scale, p["bk"], p["bv"]], axis=1)
                      for p in layers])
    return dict(
        wqkv=wqkv.astype(jnp.bfloat16), bqkv=bqkv.astype(jnp.float32),
        wo=stack("wo", jnp.bfloat16), bo=stack("bo", jnp.float32),
        ln1_g=stack("ln1_g", jnp.float32), ln1_b=stack("ln1_b", jnp.float32),
        w1=stack("w1", jnp.bfloat16), b1=stack("b1", jnp.float32),
        w2=stack("w2", jnp.bfloat16), b2=stack("b2", jnp.float32),
        ln2_g=stack("ln2_g", jnp.float32), ln2_b=stack("ln2_b", jnp.float32),
    )


def ref_forward(x, ignore_mask, layers, pe_table, num_heads):
    B, S, E = x.shape
    x = x + pe_table[:S][None]
    bias = jnp.where(ignore_mask, -1e9, 0.0)[:, None, None, :]       # (B,1,1,S)
    for p in layers:
        q = x @ p["wq"] + p["bq"][0]
        k = x @ p["wk"] + p["bk"][0]
        v = x @ p["wv"] + p["bv"][0]
        H = num_heads
        dh = E // H
        qh = q.reshape(B, S, H, dh).transpose(0, 2, 1, 3)
        kh = k.reshape(B, S, H, dh).transpose(0, 2, 1, 3)
        vh = v.reshape(B, S, H, dh).transpose(0, 2, 1, 3)
        s = jnp.einsum("bhqd,bhkd->bhqk", qh, kh) / math.sqrt(dh) + bias
        pw = jax.nn.softmax(s, axis=-1)
        a = jnp.einsum("bhqk,bhkd->bhqd", pw, vh).transpose(0, 2, 1, 3).reshape(B, S, E)
        a = a @ p["wo"] + p["bo"][0]
        x = _layer_norm(x + a, p["ln1_g"][0], p["ln1_b"][0])
        f = _gelu(x @ p["w1"] + p["b1"][0])
        f = f @ p["w2"] + p["b2"][0]
        x = _layer_norm(x + f, p["ln2_g"][0], p["ln2_b"][0])
    return x


# ------------------------------------ main ---------------------------------------

if __name__ == "__main__":
    B, S, E, H, F, L = 2, 8, 32, 4, 128, 2
    MAX_S = 16

    key = jax.random.PRNGKey(0)
    kx, kp = jax.random.split(key)
    embeddings = jax.random.normal(kx, (B, S, E), jnp.float32)
    # PyTorch key_padding_mask convention: True = ignore. Pad last 2 tokens of batch 1.
    ignore_mask = jnp.zeros((B, S), dtype=bool).at[1, S - 2:].set(True)

    layers = init_params(kp, L, E, F)
    pe_table = sawtooth_positional_encoding(MAX_S, E)
    stacked = stack_params(layers, H)

    ref = ref_forward(embeddings, ignore_mask, layers, pe_table, H)

    # Small-model path (auto-selected: all layer weights fit VMEM, no per-layer grid).
    out_fused = bidirectional_sequence_transformer(embeddings, ignore_mask, stacked,
                                                   pe_table, H)
    out_fused = jax.block_until_ready(out_fused)
    # Production path (grid over layers, pipelined per-layer weight slabs).
    out_grid = bidirectional_sequence_transformer(embeddings, ignore_mask, stacked,
                                                  pe_table, H, force_layer_grid=True)
    out_grid = jax.block_until_ready(out_grid)

    # bf16 matmul operands (f32 accumulation) vs f32 reference -> loosened tolerance.
    np.testing.assert_allclose(np.asarray(out_fused), np.asarray(ref),
                               rtol=3e-2, atol=3e-2)
    np.testing.assert_allclose(np.asarray(out_grid), np.asarray(ref),
                               rtol=3e-2, atol=3e-2)
    assert out_fused.shape == (B, S, E) and out_fused.dtype == jnp.float32
    assert out_grid.shape == (B, S, E) and out_grid.dtype == jnp.float32

    print("KERNEL_OK")
</pallas_src>

<mosaic_0001>
module attributes {stable_mosaic.version = 11 : i64} {
  func.func @_fused_all_layers_kernel(%arg0: memref<16x32xf32, #tpu.memory_space<vmem>>, %arg1: memref<16x32xf32, #tpu.memory_space<vmem>>, %arg2: memref<2x1x8xf32, #tpu.memory_space<vmem>>, %arg3: memref<2x32x96xbf16, #tpu.memory_space<vmem>>, %arg4: memref<2x1x96xf32, #tpu.memory_space<vmem>>, %arg5: memref<2x32x32xbf16, #tpu.memory_space<vmem>>, %arg6: memref<2x1x32xf32, #tpu.memory_space<vmem>>, %arg7: memref<2x1x32xf32, #tpu.memory_space<vmem>>, %arg8: memref<2x1x32xf32, #tpu.memory_space<vmem>>, %arg9: memref<2x32x128xbf16, #tpu.memory_space<vmem>>, %arg10: memref<2x1x128xf32, #tpu.memory_space<vmem>>, %arg11: memref<2x128x32xbf16, #tpu.memory_space<vmem>>, %arg12: memref<2x1x32xf32, #tpu.memory_space<vmem>>, %arg13: memref<2x1x32xf32, #tpu.memory_space<vmem>>, %arg14: memref<2x1x32xf32, #tpu.memory_space<vmem>>, %arg15: memref<16x32xf32, #tpu.memory_space<vmem>>) attributes {dimension_semantics = [], scalar_prefetch = 0 : i64, scratch_operands = 0 : i64, tpu.core_type = #tpu.core_type<tc>} {
    %c0 = arith.constant 0 : index
    %c0_0 = arith.constant 0 : index
    %0 = vector.load %arg0[%c0, %c0_0] : memref<16x32xf32, #tpu.memory_space<vmem>>, vector<16x32xf32>
    %c0_1 = arith.constant 0 : index
    %c0_2 = arith.constant 0 : index
    %1 = vector.load %arg1[%c0_1, %c0_2] : memref<16x32xf32, #tpu.memory_space<vmem>>, vector<16x32xf32>
    %2 = arith.addf %0, %1 : vector<16x32xf32>
    %c0_3 = arith.constant 0 : index
    %c0_4 = arith.constant 0 : index
    %c0_5 = arith.constant 0 : index
    %3 = vector.load %arg2[%c0_3, %c0_4, %c0_5] : memref<2x1x8xf32, #tpu.memory_space<vmem>>, vector<2x1x8xf32>
    %c0_6 = arith.constant 0 : index
    %c0_7 = arith.constant 0 : index
    %c0_8 = arith.constant 0 : index
    %4 = vector.load %arg3[%c0_6, %c0_7, %c0_8] : memref<2x32x96xbf16, #tpu.memory_space<vmem>>, vector<1x32x96xbf16>
    %5 = vector.shape_cast %4 : vector<1x32x96xbf16> to vector<32x96xbf16>
    %c0_9 = arith.constant 0 : index
    %c0_10 = arith.constant 0 : index
    %c0_11 = arith.constant 0 : index
    %6 = vector.load %arg4[%c0_9, %c0_10, %c0_11] : memref<2x1x96xf32, #tpu.memory_space<vmem>>, vector<1x1x96xf32>
    %7 = vector.shape_cast %6 : vector<1x1x96xf32> to vector<1x96xf32>
    %c0_12 = arith.constant 0 : index
    %c0_13 = arith.constant 0 : index
    %c0_14 = arith.constant 0 : index
    %8 = vector.load %arg5[%c0_12, %c0_13, %c0_14] : memref<2x32x32xbf16, #tpu.memory_space<vmem>>, vector<1x32x32xbf16>
    %9 = vector.shape_cast %8 : vector<1x32x32xbf16> to vector<32x32xbf16>
    %c0_15 = arith.constant 0 : index
    %c0_16 = arith.constant 0 : index
    %c0_17 = arith.constant 0 : index
    %10 = vector.load %arg6[%c0_15, %c0_16, %c0_17] : memref<2x1x32xf32, #tpu.memory_space<vmem>>, vector<1x1x32xf32>
    %11 = vector.shape_cast %10 : vector<1x1x32xf32> to vector<1x32xf32>
    %c0_18 = arith.constant 0 : index
    %c0_19 = arith.constant 0 : index
    %c0_20 = arith.constant 0 : index
    %12 = vector.load %arg7[%c0_18, %c0_19, %c0_20] : memref<2x1x32xf32, #tpu.memory_space<vmem>>, vector<1x1x32xf32>
    %13 = vector.shape_cast %12 : vector<1x1x32xf32> to vector<1x32xf32>
    %c0_21 = arith.constant 0 : index
    %c0_22 = arith.constant 0 : index
    %c0_23 = arith.constant 0 : index
    %14 = vector.load %arg8[%c0_21, %c0_22, %c0_23] : memref<2x1x32xf32, #tpu.memory_space<vmem>>, vector<1x1x32xf32>
    %15 = vector.shape_cast %14 : vector<1x1x32xf32> to vector<1x32xf32>
    %c0_24 = arith.constant 0 : index
    %c0_25 = arith.constant 0 : index
    %c0_26 = arith.constant 0 : index
    %16 = vector.load %arg9[%c0_24, %c0_25, %c0_26] : memref<2x32x128xbf16, #tpu.memory_space<vmem>>, vector<1x32x128xbf16>
    %17 = vector.shape_cast %16 : vector<1x32x128xbf16> to vector<32x128xbf16>
    %c0_27 = arith.constant 0 : index
    %c0_28 = arith.constant 0 : index
    %c0_29 = arith.constant 0 : index
    %18 = vector.load %arg10[%c0_27, %c0_28, %c0_29] : memref<2x1x128xf32, #tpu.memory_space<vmem>>, vector<1x1x128xf32>
    %19 = vector.shape_cast %18 : vector<1x1x128xf32> to vector<1x128xf32>
    %c0_30 = arith.constant 0 : index
    %c0_31 = arith.constant 0 : index
    %c0_32 = arith.constant 0 : index
    %20 = vector.load %arg11[%c0_30, %c0_31, %c0_32] : memref<2x128x32xbf16, #tpu.memory_space<vmem>>, vector<1x128x32xbf16>
    %21 = vector.shape_cast %20 : vector<1x128x32xbf16> to vector<128x32xbf16>
    %c0_33 = arith.constant 0 : index
    %c0_34 = arith.constant 0 : index
    %c0_35 = arith.constant 0 : index
    %22 = vector.load %arg12[%c0_33, %c0_34, %c0_35] : memref<2x1x32xf32, #tpu.memory_space<vmem>>, vector<1x1x32xf32>
    %23 = vector.shape_cast %22 : vector<1x1x32xf32> to vector<1x32xf32>
    %c0_36 = arith.constant 0 : index
    %c0_37 = arith.constant 0 : index
    %c0_38 = arith.constant 0 : index
    %24 = vector.load %arg13[%c0_36, %c0_37, %c0_38] : memref<2x1x32xf32, #tpu.memory_space<vmem>>, vector<1x1x32xf32>
    %25 = vector.shape_cast %24 : vector<1x1x32xf32> to vector<1x32xf32>
    %c0_39 = arith.constant 0 : index
    %c0_40 = arith.constant 0 : index
    %c0_41 = arith.constant 0 : index
    %26 = vector.load %arg14[%c0_39, %c0_40, %c0_41] : memref<2x1x32xf32, #tpu.memory_space<vmem>>, vector<1x1x32xf32>
    %27 = vector.shape_cast %26 : vector<1x1x32xf32> to vector<1x32xf32>
    %28 = arith.truncf %2 : vector<16x32xf32> to vector<16x32xbf16>
    %cst = arith.constant dense<0.000000e+00> : vector<16x96xf32>
    %29 = tpu.matmul %28, %5, %cst {dimension_numbers = #tpu.dot_dimension_numbers<[1], [0], [0], [1], [0, 0, 1, 1], [], []>} : vector<16x32xbf16>, vector<32x96xbf16>, vector<16x96xf32> -> vector<16x96xf32>
    %30 = vector.broadcast %7 : vector<1x96xf32> to vector<16x96xf32>
    %31 = arith.addf %29, %30 : vector<16x96xf32>
    %32 = arith.truncf %31 : vector<16x96xf32> to vector<16x96xbf16>
    %33 = vector.extract_strided_slice %32 {offsets = [0, 0], sizes = [16, 8], strides = [1, 1]} : vector<16x96xbf16> to vector<16x8xbf16>
    %34 = vector.shape_cast %33 : vector<16x8xbf16> to vector<2x8x8xbf16>
    %35 = vector.extract_strided_slice %32 {offsets = [0, 32], sizes = [16, 8], strides = [1, 1]} : vector<16x96xbf16> to vector<16x8xbf16>
    %36 = vector.shape_cast %35 : vector<16x8xbf16> to vector<2x8x8xbf16>
    %37 = vector.extract_strided_slice %32 {offsets = [0, 64], sizes = [16, 8], strides = [1, 1]} : vector<16x96xbf16> to vector<16x8xbf16>
    %38 = vector.shape_cast %37 : vector<16x8xbf16> to vector<2x8x8xbf16>
    "tpu.trace_start"() <{level = 10 : i32, message = "bqd,bkd->bqk"}> : () -> ()
    %cst_42 = arith.constant dense<0.000000e+00> : vector<2x8x8xf32>
    %39 = tpu.matmul %34, %36, %cst_42 {dimension_numbers = #tpu.dot_dimension_numbers<[2], [2], [1], [1], [0, 0, 0, 1, 1, 1], [0], [0]>} : vector<2x8x8xbf16>, vector<2x8x8xbf16>, vector<2x8x8xf32> -> vector<2x8x8xf32>
    "tpu.trace_stop"() : () -> ()
    %40 = vector.broadcast %3 : vector<2x1x8xf32> to vector<2x8x8xf32>
    %41 = arith.addf %39, %40 : vector<2x8x8xf32>
    %cst_43 = arith.constant dense<0xFF800000> : vector<2x8xf32>
    %42 = vector.multi_reduction <maximumf>, %41, %cst_43 [2] : vector<2x8x8xf32> to vector<2x8xf32>
    %43 = vector.shape_cast %42 : vector<2x8xf32> to vector<2x8x1xf32>
    %44 = vector.broadcast %43 : vector<2x8x1xf32> to vector<2x8x8xf32>
    %45 = arith.subf %41, %44 : vector<2x8x8xf32>
    %46 = math.exp %45 : vector<2x8x8xf32>
    %cst_44 = arith.constant dense<0.000000e+00> : vector<2x8xf32>
    %47 = vector.multi_reduction <add>, %46, %cst_44 [2] : vector<2x8x8xf32> to vector<2x8xf32>
    %48 = vector.shape_cast %47 : vector<2x8xf32> to vector<2x8x1xf32>
    %49 = tpu.reciprocal %48 {approx = true} : vector<2x8x1xf32> -> vector<2x8x1xf32>
    %50 = vector.broadcast %49 : vector<2x8x1xf32> to vector<2x8x8xf32>
    %51 = arith.mulf %46, %50 : vector<2x8x8xf32>
    %52 = arith.truncf %51 : vector<2x8x8xf32> to vector<2x8x8xbf16>
    "tpu.trace_start"() <{level = 10 : i32, message = "bqk,bkd->bqd"}> : () -> ()
    %cst_45 = arith.constant dense<0.000000e+00> : vector<2x8x8xf32>
    %53 = tpu.matmul %52, %38, %cst_45 {dimension_numbers = #tpu.dot_dimension_numbers<[2], [1], [1], [2], [0, 0, 0, 1, 1, 2], [0], [0]>} : vector<2x8x8xbf16>, vector<2x8x8xbf16>, vector<2x8x8xf32> -> vector<2x8x8xf32>
    "tpu.trace_stop"() : () -> ()
    %54 = vector.extract_strided_slice %32 {offsets = [0, 8], sizes = [16, 8], strides = [1, 1]} : vector<16x96xbf16> to vector<16x8xbf16>
    %55 = vector.shape_cast %54 : vector<16x8xbf16> to vector<2x8x8xbf16>
    %56 = vector.extract_strided_slice %32 {offsets = [0, 40], sizes = [16, 8], strides = [1, 1]} : vector<16x96xbf16> to vector<16x8xbf16>
    %57 = vector.shape_cast %56 : vector<16x8xbf16> to vector<2x8x8xbf16>
    %58 = vector.extract_strided_slice %32 {offsets = [0, 72], sizes = [16, 8], strides = [1, 1]} : vector<16x96xbf16> to vector<16x8xbf16>
    %59 = vector.shape_cast %58 : vector<16x8xbf16> to vector<2x8x8xbf16>
    "tpu.trace_start"() <{level = 10 : i32, message = "bqd,bkd->bqk"}> : () -> ()
    %cst_46 = arith.constant dense<0.000000e+00> : vector<2x8x8xf32>
    %60 = tpu.matmul %55, %57, %cst_46 {dimension_numbers = #tpu.dot_dimension_numbers<[2], [2], [1], [1], [0, 0, 0, 1, 1, 1], [0], [0]>} : vector<2x8x8xbf16>, vector<2x8x8xbf16>, vector<2x8x8xf32> -> vector<2x8x8xf32>
    "tpu.trace_stop"() : () -> ()
    %61 = vector.broadcast %3 : vector<2x1x8xf32> to vector<2x8x8xf32>
    %62 = arith.addf %60, %61 : vector<2x8x8xf32>
    %cst_47 = arith.constant dense<0xFF800000> : vector<2x8xf32>
    %63 = vector.multi_reduction <maximumf>, %62, %cst_47 [2] : vector<2x8x8xf32> to vector<2x8xf32>
    %64 = vector.shape_cast %63 : vector<2x8xf32> to vector<2x8x1xf32>
    %65 = vector.broadcast %64 : vector<2x8x1xf32> to vector<2x8x8xf32>
    %66 = arith.subf %62, %65 : vector<2x8x8xf32>
    %67 = math.exp %66 : vector<2x8x8xf32>
    %cst_48 = arith.constant dense<0.000000e+00> : vector<2x8xf32>
    %68 = vector.multi_reduction <add>, %67, %cst_48 [2] : vector<2x8x8xf32> to vector<2x8xf32>
    %69 = vector.shape_cast %68 : vector<2x8xf32> to vector<2x8x1xf32>
    %70 = tpu.reciprocal %69 {approx = true} : vector<2x8x1xf32> -> vector<2x8x1xf32>
    %71 = vector.broadcast %70 : vector<2x8x1xf32> to vector<2x8x8xf32>
    %72 = arith.mulf %67, %71 : vector<2x8x8xf32>
    %73 = arith.truncf %72 : vector<2x8x8xf32> to vector<2x8x8xbf16>
    "tpu.trace_start"() <{level = 10 : i32, message = "bqk,bkd->bqd"}> : () -> ()
    %cst_49 = arith.constant dense<0.000000e+00> : vector<2x8x8xf32>
    %74 = tpu.matmul %73, %59, %cst_49 {dimension_numbers = #tpu.dot_dimension_numbers<[2], [1], [1], [2], [0, 0, 0, 1, 1, 2], [0], [0]>} : vector<2x8x8xbf16>, vector<2x8x8xbf16>, vector<2x8x8xf32> -> vector<2x8x8xf32>
    "tpu.trace_stop"() : () -> ()
    %75 = vector.extract_strided_slice %32 {offsets = [0, 16], sizes = [16, 8], strides = [1, 1]} : vector<16x96xbf16> to vector<16x8xbf16>
    %76 = vector.shape_cast %75 : vector<16x8xbf16> to vector<2x8x8xbf16>
    %77 = vector.extract_strided_slice %32 {offsets = [0, 48], sizes = [16, 8], strides = [1, 1]} : vector<16x96xbf16> to vector<16x8xbf16>
    %78 = vector.shape_cast %77 : vector<16x8xbf16> to vector<2x8x8xbf16>
    %79 = vector.extract_strided_slice %32 {offsets = [0, 80], sizes = [16, 8], strides = [1, 1]} : vector<16x96xbf16> to vector<16x8xbf16>
    %80 = vector.shape_cast %79 : vector<16x8xbf16> to vector<2x8x8xbf16>
    "tpu.trace_start"() <{level = 10 : i32, message = "bqd,bkd->bqk"}> : () -> ()
    %cst_50 = arith.constant dense<0.000000e+00> : vector<2x8x8xf32>
    %81 = tpu.matmul %76, %78, %cst_50 {dimension_numbers = #tpu.dot_dimension_numbers<[2], [2], [1], [1], [0, 0, 0, 1, 1, 1], [0], [0]>} : vector<2x8x8xbf16>, vector<2x8x8xbf16>, vector<2x8x8xf32> -> vector<2x8x8xf32>
    "tpu.trace_stop"() : () -> ()
    %82 = vector.broadcast %3 : vector<2x1x8xf32> to vector<2x8x8xf32>
    %83 = arith.addf %81, %82 : vector<2x8x8xf32>
    %cst_51 = arith.constant dense<0xFF800000> : vector<2x8xf32>
    %84 = vector.multi_reduction <maximumf>, %83, %cst_51 [2] : vector<2x8x8xf32> to vector<2x8xf32>
    %85 = vector.shape_cast %84 : vector<2x8xf32> to vector<2x8x1xf32>
    %86 = vector.broadcast %85 : vector<2x8x1xf32> to vector<2x8x8xf32>
    %87 = arith.subf %83, %86 : vector<2x8x8xf32>
    %88 = math.exp %87 : vector<2x8x8xf32>
    %cst_52 = arith.constant dense<0.000000e+00> : vector<2x8xf32>
    %89 = vector.multi_reduction <add>, %88, %cst_52 [2] : vector<2x8x8xf32> to vector<2x8xf32>
    %90 = vector.shape_cast %89 : vector<2x8xf32> to vector<2x8x1xf32>
    %91 = tpu.reciprocal %90 {approx = true} : vector<2x8x1xf32> -> vector<2x8x1xf32>
    %92 = vector.broadcast %91 : vector<2x8x1xf32> to vector<2x8x8xf32>
    %93 = arith.mulf %88, %92 : vector<2x8x8xf32>
    %94 = arith.truncf %93 : vector<2x8x8xf32> to vector<2x8x8xbf16>
    "tpu.trace_start"() <{level = 10 : i32, message = "bqk,bkd->bqd"}> : () -> ()
    %cst_53 = arith.constant dense<0.000000e+00> : vector<2x8x8xf32>
    %95 = tpu.matmul %94, %80, %cst_53 {dimension_numbers = #tpu.dot_dimension_numbers<[2], [1], [1], [2], [0, 0, 0, 1, 1, 2], [0], [0]>} : vector<2x8x8xbf16>, vector<2x8x8xbf16>, vector<2x8x8xf32> -> vector<2x8x8xf32>
    "tpu.trace_stop"() : () -> ()
    %96 = vector.extract_strided_slice %32 {offsets = [0, 24], sizes = [16, 8], strides = [1, 1]} : vector<16x96xbf16> to vector<16x8xbf16>
    %97 = vector.shape_cast %96 : vector<16x8xbf16> to vector<2x8x8xbf16>
    %98 = vector.extract_strided_slice %32 {offsets = [0, 56], sizes = [16, 8], strides = [1, 1]} : vector<16x96xbf16> to vector<16x8xbf16>
    %99 = vector.shape_cast %98 : vector<16x8xbf16> to vector<2x8x8xbf16>
    %100 = vector.extract_strided_slice %32 {offsets = [0, 88], sizes = [16, 8], strides = [1, 1]} : vector<16x96xbf16> to vector<16x8xbf16>
    %101 = vector.shape_cast %100 : vector<16x8xbf16> to vector<2x8x8xbf16>
    "tpu.trace_start"() <{level = 10 : i32, message = "bqd,bkd->bqk"}> : () -> ()
    %cst_54 = arith.constant dense<0.000000e+00> : vector<2x8x8xf32>
    %102 = tpu.matmul %97, %99, %cst_54 {dimension_numbers = #tpu.dot_dimension_numbers<[2], [2], [1], [1], [0, 0, 0, 1, 1, 1], [0], [0]>} : vector<2x8x8xbf16>, vector<2x8x8xbf16>, vector<2x8x8xf32> -> vector<2x8x8xf32>
    "tpu.trace_stop"() : () -> ()
    %103 = vector.broadcast %3 : vector<2x1x8xf32> to vector<2x8x8xf32>
    %104 = arith.addf %102, %103 : vector<2x8x8xf32>
    %cst_55 = arith.constant dense<0xFF800000> : vector<2x8xf32>
    %105 = vector.multi_reduction <maximumf>, %104, %cst_55 [2] : vector<2x8x8xf32> to vector<2x8xf32>
    %106 = vector.shape_cast %105 : vector<2x8xf32> to vector<2x8x1xf32>
    %107 = vector.broadcast %106 : vector<2x8x1xf32> to vector<2x8x8xf32>
    %108 = arith.subf %104, %107 : vector<2x8x8xf32>
    %109 = math.exp %108 : vector<2x8x8xf32>
    %cst_56 = arith.constant dense<0.000000e+00> : vector<2x8xf32>
    %110 = vector.multi_reduction <add>, %109, %cst_56 [2] : vector<2x8x8xf32> to vector<2x8xf32>
    %111 = vector.shape_cast %110 : vector<2x8xf32> to vector<2x8x1xf32>
    %112 = tpu.reciprocal %111 {approx = true} : vector<2x8x1xf32> -> vector<2x8x1xf32>
    %113 = vector.broadcast %112 : vector<2x8x1xf32> to vector<2x8x8xf32>
    %114 = arith.mulf %109, %113 : vector<2x8x8xf32>
    %115 = arith.truncf %114 : vector<2x8x8xf32> to vector<2x8x8xbf16>
    "tpu.trace_start"() <{level = 10 : i32, message = "bqk,bkd->bqd"}> : () -> ()
    %cst_57 = arith.constant dense<0.000000e+00> : vector<2x8x8xf32>
    %116 = tpu.matmul %115, %101, %cst_57 {dimension_numbers = #tpu.dot_dimension_numbers<[2], [1], [1], [2], [0, 0, 0, 1, 1, 2], [0], [0]>} : vector<2x8x8xbf16>, vector<2x8x8xbf16>, vector<2x8x8xf32> -> vector<2x8x8xf32>
    "tpu.trace_stop"() : () -> ()
    %117 = tpu.concatenate %53, %74, %95, %116 in 2 : vector<2x8x8xf32>, vector<2x8x8xf32>, vector<2x8x8xf32>, vector<2x8x8xf32> -> vector<2x8x32xf32>
    %118 = vector.shape_cast %117 : vector<2x8x32xf32> to vector<16x32xf32>
    %119 = arith.truncf %118 : vector<16x32xf32> to vector<16x32xbf16>
    %cst_58 = arith.constant dense<0.000000e+00> : vector<16x32xf32>
    %120 = tpu.matmul %119, %9, %cst_58 {dimension_numbers = #tpu.dot_dimension_numbers<[1], [0], [0], [1], [0, 0, 1, 1], [], []>} : vector<16x32xbf16>, vector<32x32xbf16>, vector<16x32xf32> -> vector<16x32xf32>
    %121 = vector.broadcast %11 : vector<1x32xf32> to vector<16x32xf32>
    %122 = arith.addf %120, %121 : vector<16x32xf32>
    %123 = arith.addf %2, %122 : vector<16x32xf32>
    %cst_59 = arith.constant dense<0.000000e+00> : vector<16xf32>
    %124 = vector.multi_reduction <add>, %123, %cst_59 [1] : vector<16x32xf32> to vector<16xf32>
    %125 = vector.shape_cast %124 : vector<16xf32> to vector<16x1xf32>
    %cst_60 = arith.constant 3.200000e+01 : f32
    %126 = vector.broadcast %cst_60 : f32 to vector<16x1xf32>
    %127 = arith.divf %125, %126 : vector<16x1xf32>
    %128 = vector.broadcast %127 : vector<16x1xf32> to vector<16x32xf32>
    %129 = arith.subf %123, %128 : vector<16x32xf32>
    %130 = vector.broadcast %127 : vector<16x1xf32> to vector<16x32xf32>
    %131 = arith.subf %123, %130 : vector<16x32xf32>
    %132 = arith.mulf %129, %131 : vector<16x32xf32>
    %cst_61 = arith.constant dense<0.000000e+00> : vector<16xf32>
    %133 = vector.multi_reduction <add>, %132, %cst_61 [1] : vector<16x32xf32> to vector<16xf32>
    %134 = vector.shape_cast %133 : vector<16xf32> to vector<16x1xf32>
    %cst_62 = arith.constant 3.200000e+01 : f32
    %135 = vector.broadcast %cst_62 : f32 to vector<16x1xf32>
    %136 = arith.divf %134, %135 : vector<16x1xf32>
    %cst_63 = arith.constant 9.99999974E-6 : f32
    %137 = vector.broadcast %cst_63 : f32 to vector<16x1xf32>
    %138 = arith.addf %136, %137 : vector<16x1xf32>
    %139 = math.rsqrt %138 : vector<16x1xf32>
    %140 = vector.broadcast %127 : vector<16x1xf32> to vector<16x32xf32>
    %141 = arith.subf %123, %140 : vector<16x32xf32>
    %142 = vector.broadcast %139 : vector<16x1xf32> to vector<16x32xf32>
    %143 = arith.mulf %141, %142 : vector<16x32xf32>
    %144 = vector.broadcast %13 : vector<1x32xf32> to vector<16x32xf32>
    %145 = arith.mulf %143, %144 : vector<16x32xf32>
    %146 = vector.broadcast %15 : vector<1x32xf32> to vector<16x32xf32>
    %147 = arith.addf %145, %146 : vector<16x32xf32>
    %148 = arith.truncf %147 : vector<16x32xf32> to vector<16x32xbf16>
    %cst_64 = arith.constant dense<0.000000e+00> : vector<16x128xf32>
    %149 = tpu.matmul %148, %17, %cst_64 {dimension_numbers = #tpu.dot_dimension_numbers<[1], [0], [0], [1], [0, 0, 1, 1], [], []>} : vector<16x32xbf16>, vector<32x128xbf16>, vector<16x128xf32> -> vector<16x128xf32>
    %150 = vector.broadcast %19 : vector<1x128xf32> to vector<16x128xf32>
    %151 = arith.addf %149, %150 : vector<16x128xf32>
    %cst_65 = arith.constant 5.000000e-01 : f32
    %152 = vector.broadcast %cst_65 : f32 to vector<16x128xf32>
    %153 = arith.mulf %152, %151 : vector<16x128xf32>
    %cst_66 = arith.constant 4.471500e-02 : f32
    %154 = vector.broadcast %cst_66 : f32 to vector<16x128xf32>
    %155 = arith.mulf %154, %151 : vector<16x128xf32>
    %156 = arith.mulf %155, %151 : vector<16x128xf32>
    %157 = arith.mulf %156, %151 : vector<16x128xf32>
    %158 = arith.addf %151, %157 : vector<16x128xf32>
    %cst_67 = arith.constant 0.797884583 : f32
    %159 = vector.broadcast %cst_67 : f32 to vector<16x128xf32>
    %160 = arith.mulf %159, %158 : vector<16x128xf32>
    %161 = math.tanh %160 : vector<16x128xf32>
    %cst_68 = arith.constant 1.000000e+00 : f32
    %162 = vector.broadcast %cst_68 : f32 to vector<16x128xf32>
    %163 = arith.addf %162, %161 : vector<16x128xf32>
    %164 = arith.mulf %153, %163 : vector<16x128xf32>
    %165 = arith.truncf %164 : vector<16x128xf32> to vector<16x128xbf16>
    %cst_69 = arith.constant dense<0.000000e+00> : vector<16x32xf32>
    %166 = tpu.matmul %165, %21, %cst_69 {dimension_numbers = #tpu.dot_dimension_numbers<[1], [0], [0], [1], [0, 0, 1, 1], [], []>} : vector<16x128xbf16>, vector<128x32xbf16>, vector<16x32xf32> -> vector<16x32xf32>
    %167 = vector.broadcast %23 : vector<1x32xf32> to vector<16x32xf32>
    %168 = arith.addf %166, %167 : vector<16x32xf32>
    %169 = arith.addf %147, %168 : vector<16x32xf32>
    %cst_70 = arith.constant dense<0.000000e+00> : vector<16xf32>
    %170 = vector.multi_reduction <add>, %169, %cst_70 [1] : vector<16x32xf32> to vector<16xf32>
    %171 = vector.shape_cast %170 : vector<16xf32> to vector<16x1xf32>
    %cst_71 = arith.constant 3.200000e+01 : f32
    %172 = vector.broadcast %cst_71 : f32 to vector<16x1xf32>
    %173 = arith.divf %171, %172 : vector<16x1xf32>
    %174 = vector.broadcast %173 : vector<16x1xf32> to vector<16x32xf32>
    %175 = arith.subf %169, %174 : vector<16x32xf32>
    %176 = vector.broadcast %173 : vector<16x1xf32> to vector<16x32xf32>
    %177 = arith.subf %169, %176 : vector<16x32xf32>
    %178 = arith.mulf %175, %177 : vector<16x32xf32>
    %cst_72 = arith.constant dense<0.000000e+00> : vector<16xf32>
    %179 = vector.multi_reduction <add>, %178, %cst_72 [1] : vector<16x32xf32> to vector<16xf32>
    %180 = vector.shape_cast %179 : vector<16xf32> to vector<16x1xf32>
    %cst_73 = arith.constant 3.200000e+01 : f32
    %181 = vector.broadcast %cst_73 : f32 to vector<16x1xf32>
    %182 = arith.divf %180, %181 : vector<16x1xf32>
    %cst_74 = arith.constant 9.99999974E-6 : f32
    %183 = vector.broadcast %cst_74 : f32 to vector<16x1xf32>
    %184 = arith.addf %182, %183 : vector<16x1xf32>
    %185 = math.rsqrt %184 : vector<16x1xf32>
    %186 = vector.broadcast %173 : vector<16x1xf32> to vector<16x32xf32>
    %187 = arith.subf %169, %186 : vector<16x32xf32>
    %188 = vector.broadcast %185 : vector<16x1xf32> to vector<16x32xf32>
    %189 = arith.mulf %187, %188 : vector<16x32xf32>
    %190 = vector.broadcast %25 : vector<1x32xf32> to vector<16x32xf32>
    %191 = arith.mulf %189, %190 : vector<16x32xf32>
    %192 = vector.broadcast %27 : vector<1x32xf32> to vector<16x32xf32>
    %193 = arith.addf %191, %192 : vector<16x32xf32>
    %c1 = arith.constant 1 : index
    %c0_75 = arith.constant 0 : index
    %c0_76 = arith.constant 0 : index
    %194 = vector.load %arg3[%c1, %c0_75, %c0_76] : memref<2x32x96xbf16, #tpu.memory_space<vmem>>, vector<1x32x96xbf16>
    %195 = vector.shape_cast %194 : vector<1x32x96xbf16> to vector<32x96xbf16>
    %c1_77 = arith.constant 1 : index
    %c0_78 = arith.constant 0 : index
    %c0_79 = arith.constant 0 : index
    %196 = vector.load %arg4[%c1_77, %c0_78, %c0_79] : memref<2x1x96xf32, #tpu.memory_space<vmem>>, vector<1x1x96xf32>
    %197 = vector.shape_cast %196 : vector<1x1x96xf32> to vector<1x96xf32>
    %c1_80 = arith.constant 1 : index
    %c0_81 = arith.constant 0 : index
    %c0_82 = arith.constant 0 : index
    %198 = vector.load %arg5[%c1_80, %c0_81, %c0_82] : memref<2x32x32xbf16, #tpu.memory_space<vmem>>, vector<1x32x32xbf16>
    %199 = vector.shape_cast %198 : vector<1x32x32xbf16> to vector<32x32xbf16>
    %c1_83 = arith.constant 1 : index
    %c0_84 = arith.constant 0 : index
    %c0_85 = arith.constant 0 : index
    %200 = vector.load %arg6[%c1_83, %c0_84, %c0_85] : memref<2x1x32xf32, #tpu.memory_space<vmem>>, vector<1x1x32xf32>
    %201 = vector.shape_cast %200 : vector<1x1x32xf32> to vector<1x32xf32>
    %c1_86 = arith.constant 1 : index
    %c0_87 = arith.constant 0 : index
    %c0_88 = arith.constant 0 : index
    %202 = vector.load %arg7[%c1_86, %c0_87, %c0_88] : memref<2x1x32xf32, #tpu.memory_space<vmem>>, vector<1x1x32xf32>
    %203 = vector.shape_cast %202 : vector<1x1x32xf32> to vector<1x32xf32>
    %c1_89 = arith.constant 1 : index
    %c0_90 = arith.constant 0 : index
    %c0_91 = arith.constant 0 : index
    %204 = vector.load %arg8[%c1_89, %c0_90, %c0_91] : memref<2x1x32xf32, #tpu.memory_space<vmem>>, vector<1x1x32xf32>
    %205 = vector.shape_cast %204 : vector<1x1x32xf32> to vector<1x32xf32>
    %c1_92 = arith.constant 1 : index
    %c0_93 = arith.constant 0 : index
    %c0_94 = arith.constant 0 : index
    %206 = vector.load %arg9[%c1_92, %c0_93, %c0_94] : memref<2x32x128xbf16, #tpu.memory_space<vmem>>, vector<1x32x128xbf16>
    %207 = vector.shape_cast %206 : vector<1x32x128xbf16> to vector<32x128xbf16>
    %c1_95 = arith.constant 1 : index
    %c0_96 = arith.constant 0 : index
    %c0_97 = arith.constant 0 : index
    %208 = vector.load %arg10[%c1_95, %c0_96, %c0_97] : memref<2x1x128xf32, #tpu.memory_space<vmem>>, vector<1x1x128xf32>
    %209 = vector.shape_cast %208 : vector<1x1x128xf32> to vector<1x128xf32>
    %c1_98 = arith.constant 1 : index
    %c0_99 = arith.constant 0 : index
    %c0_100 = arith.constant 0 : index
    %210 = vector.load %arg11[%c1_98, %c0_99, %c0_100] : memref<2x128x32xbf16, #tpu.memory_space<vmem>>, vector<1x128x32xbf16>
    %211 = vector.shape_cast %210 : vector<1x128x32xbf16> to vector<128x32xbf16>
    %c1_101 = arith.constant 1 : index
    %c0_102 = arith.constant 0 : index
    %c0_103 = arith.constant 0 : index
    %212 = vector.load %arg12[%c1_101, %c0_102, %c0_103] : memref<2x1x32xf32, #tpu.memory_space<vmem>>, vector<1x1x32xf32>
    %213 = vector.shape_cast %212 : vector<1x1x32xf32> to vector<1x32xf32>
    %c1_104 = arith.constant 1 : index
    %c0_105 = arith.constant 0 : index
    %c0_106 = arith.constant 0 : index
    %214 = vector.load %arg13[%c1_104, %c0_105, %c0_106] : memref<2x1x32xf32, #tpu.memory_space<vmem>>, vector<1x1x32xf32>
    %215 = vector.shape_cast %214 : vector<1x1x32xf32> to vector<1x32xf32>
    %c1_107 = arith.constant 1 : index
    %c0_108 = arith.constant 0 : index
    %c0_109 = arith.constant 0 : index
    %216 = vector.load %arg14[%c1_107, %c0_108, %c0_109] : memref<2x1x32xf32, #tpu.memory_space<vmem>>, vector<1x1x32xf32>
    %217 = vector.shape_cast %216 : vector<1x1x32xf32> to vector<1x32xf32>
    %218 = arith.truncf %193 : vector<16x32xf32> to vector<16x32xbf16>
    %cst_110 = arith.constant dense<0.000000e+00> : vector<16x96xf32>
    %219 = tpu.matmul %218, %195, %cst_110 {dimension_numbers = #tpu.dot_dimension_numbers<[1], [0], [0], [1], [0, 0, 1, 1], [], []>} : vector<16x32xbf16>, vector<32x96xbf16>, vector<16x96xf32> -> vector<16x96xf32>
    %220 = vector.broadcast %197 : vector<1x96xf32> to vector<16x96xf32>
    %221 = arith.addf %219, %220 : vector<16x96xf32>
    %222 = arith.truncf %221 : vector<16x96xf32> to vector<16x96xbf16>
    %223 = vector.extract_strided_slice %222 {offsets = [0, 0], sizes = [16, 8], strides = [1, 1]} : vector<16x96xbf16> to vector<16x8xbf16>
    %224 = vector.shape_cast %223 : vector<16x8xbf16> to vector<2x8x8xbf16>
    %225 = vector.extract_strided_slice %222 {offsets = [0, 32], sizes = [16, 8], strides = [1, 1]} : vector<16x96xbf16> to vector<16x8xbf16>
    %226 = vector.shape_cast %225 : vector<16x8xbf16> to vector<2x8x8xbf16>
    %227 = vector.extract_strided_slice %222 {offsets = [0, 64], sizes = [16, 8], strides = [1, 1]} : vector<16x96xbf16> to vector<16x8xbf16>
    %228 = vector.shape_cast %227 : vector<16x8xbf16> to vector<2x8x8xbf16>
    "tpu.trace_start"() <{level = 10 : i32, message = "bqd,bkd->bqk"}> : () -> ()
    %cst_111 = arith.constant dense<0.000000e+00> : vector<2x8x8xf32>
    %229 = tpu.matmul %224, %226, %cst_111 {dimension_numbers = #tpu.dot_dimension_numbers<[2], [2], [1], [1], [0, 0, 0, 1, 1, 1], [0], [0]>} : vector<2x8x8xbf16>, vector<2x8x8xbf16>, vector<2x8x8xf32> -> vector<2x8x8xf32>
    "tpu.trace_stop"() : () -> ()
    %230 = vector.broadcast %3 : vector<2x1x8xf32> to vector<2x8x8xf32>
    %231 = arith.addf %229, %230 : vector<2x8x8xf32>
    %cst_112 = arith.constant dense<0xFF800000> : vector<2x8xf32>
    %232 = vector.multi_reduction <maximumf>, %231, %cst_112 [2] : vector<2x8x8xf32> to vector<2x8xf32>
    %233 = vector.shape_cast %232 : vector<2x8xf32> to vector<2x8x1xf32>
    %234 = vector.broadcast %233 : vector<2x8x1xf32> to vector<2x8x8xf32>
    %235 = arith.subf %231, %234 : vector<2x8x8xf32>
    %236 = math.exp %235 : vector<2x8x8xf32>
    %cst_113 = arith.constant dense<0.000000e+00> : vector<2x8xf32>
    %237 = vector.multi_reduction <add>, %236, %cst_113 [2] : vector<2x8x8xf32> to vector<2x8xf32>
    %238 = vector.shape_cast %237 : vector<2x8xf32> to vector<2x8x1xf32>
    %239 = tpu.reciprocal %238 {approx = true} : vector<2x8x1xf32> -> vector<2x8x1xf32>
    %240 = vector.broadcast %239 : vector<2x8x1xf32> to vector<2x8x8xf32>
    %241 = arith.mulf %236, %240 : vector<2x8x8xf32>
    %242 = arith.truncf %241 : vector<2x8x8xf32> to vector<2x8x8xbf16>
    "tpu.trace_start"() <{level = 10 : i32, message = "bqk,bkd->bqd"}> : () -> ()
    %cst_114 = arith.constant dense<0.000000e+00> : vector<2x8x8xf32>
    %243 = tpu.matmul %242, %228, %cst_114 {dimension_numbers = #tpu.dot_dimension_numbers<[2], [1], [1], [2], [0, 0, 0, 1, 1, 2], [0], [0]>} : vector<2x8x8xbf16>, vector<2x8x8xbf16>, vector<2x8x8xf32> -> vector<2x8x8xf32>
    "tpu.trace_stop"() : () -> ()
    %244 = vector.extract_strided_slice %222 {offsets = [0, 8], sizes = [16, 8], strides = [1, 1]} : vector<16x96xbf16> to vector<16x8xbf16>
    %245 = vector.shape_cast %244 : vector<16x8xbf16> to vector<2x8x8xbf16>
    %246 = vector.extract_strided_slice %222 {offsets = [0, 40], sizes = [16, 8], strides = [1, 1]} : vector<16x96xbf16> to vector<16x8xbf16>
    %247 = vector.shape_cast %246 : vector<16x8xbf16> to vector<2x8x8xbf16>
    %248 = vector.extract_strided_slice %222 {offsets = [0, 72], sizes = [16, 8], strides = [1, 1]} : vector<16x96xbf16> to vector<16x8xbf16>
    %249 = vector.shape_cast %248 : vector<16x8xbf16> to vector<2x8x8xbf16>
    "tpu.trace_start"() <{level = 10 : i32, message = "bqd,bkd->bqk"}> : () -> ()
    %cst_115 = arith.constant dense<0.000000e+00> : vector<2x8x8xf32>
    %250 = tpu.matmul %245, %247, %cst_115 {dimension_numbers = #tpu.dot_dimension_numbers<[2], [2], [1], [1], [0, 0, 0, 1, 1, 1], [0], [0]>} : vector<2x8x8xbf16>, vector<2x8x8xbf16>, vector<2x8x8xf32> -> vector<2x8x8xf32>
    "tpu.trace_stop"() : () -> ()
    %251 = vector.broadcast %3 : vector<2x1x8xf32> to vector<2x8x8xf32>
    %252 = arith.addf %250, %251 : vector<2x8x8xf32>
    %cst_116 = arith.constant dense<0xFF800000> : vector<2x8xf32>
    %253 = vector.multi_reduction <maximumf>, %252, %cst_116 [2] : vector<2x8x8xf32> to vector<2x8xf32>
    %254 = vector.shape_cast %253 : vector<2x8xf32> to vector<2x8x1xf32>
    %255 = vector.broadcast %254 : vector<2x8x1xf32> to vector<2x8x8xf32>
    %256 = arith.subf %252, %255 : vector<2x8x8xf32>
    %257 = math.exp %256 : vector<2x8x8xf32>
    %cst_117 = arith.constant dense<0.000000e+00> : vector<2x8xf32>
    %258 = vector.multi_reduction <add>, %257, %cst_117 [2] : vector<2x8x8xf32> to vector<2x8xf32>
    %259 = vector.shape_cast %258 : vector<2x8xf32> to vector<2x8x1xf32>
    %260 = tpu.reciprocal %259 {approx = true} : vector<2x8x1xf32> -> vector<2x8x1xf32>
    %261 = vector.broadcast %260 : vector<2x8x1xf32> to vector<2x8x8xf32>
    %262 = arith.mulf %257, %261 : vector<2x8x8xf32>
    %263 = arith.truncf %262 : vector<2x8x8xf32> to vector<2x8x8xbf16>
    "tpu.trace_start"() <{level = 10 : i32, message = "bqk,bkd->bqd"}> : () -> ()
    %cst_118 = arith.constant dense<0.000000e+00> : vector<2x8x8xf32>
    %264 = tpu.matmul %263, %249, %cst_118 {dimension_numbers = #tpu.dot_dimension_numbers<[2], [1], [1], [2], [0, 0, 0, 1, 1, 2], [0], [0]>} : vector<2x8x8xbf16>, vector<2x8x8xbf16>, vector<2x8x8xf32> -> vector<2x8x8xf32>
    "tpu.trace_stop"() : () -> ()
    %265 = vector.extract_strided_slice %222 {offsets = [0, 16], sizes = [16, 8], strides = [1, 1]} : vector<16x96xbf16> to vector<16x8xbf16>
    %266 = vector.shape_cast %265 : vector<16x8xbf16> to vector<2x8x8xbf16>
    %267 = vector.extract_strided_slice %222 {offsets = [0, 48], sizes = [16, 8], strides = [1, 1]} : vector<16x96xbf16> to vector<16x8xbf16>
    %268 = vector.shape_cast %267 : vector<16x8xbf16> to vector<2x8x8xbf16>
    %269 = vector.extract_strided_slice %222 {offsets = [0, 80], sizes = [16, 8], strides = [1, 1]} : vector<16x96xbf16> to vector<16x8xbf16>
    %270 = vector.shape_cast %269 : vector<16x8xbf16> to vector<2x8x8xbf16>
    "tpu.trace_start"() <{level = 10 : i32, message = "bqd,bkd->bqk"}> : () -> ()
    %cst_119 = arith.constant dense<0.000000e+00> : vector<2x8x8xf32>
    %271 = tpu.matmul %266, %268, %cst_119 {dimension_numbers = #tpu.dot_dimension_numbers<[2], [2], [1], [1], [0, 0, 0, 1, 1, 1], [0], [0]>} : vector<2x8x8xbf16>, vector<2x8x8xbf16>, vector<2x8x8xf32> -> vector<2x8x8xf32>
    "tpu.trace_stop"() : () -> ()
    %272 = vector.broadcast %3 : vector<2x1x8xf32> to vector<2x8x8xf32>
    %273 = arith.addf %271, %272 : vector<2x8x8xf32>
    %cst_120 = arith.constant dense<0xFF800000> : vector<2x8xf32>
    %274 = vector.multi_reduction <maximumf>, %273, %cst_120 [2] : vector<2x8x8xf32> to vector<2x8xf32>
    %275 = vector.shape_cast %274 : vector<2x8xf32> to vector<2x8x1xf32>
    %276 = vector.broadcast %275 : vector<2x8x1xf32> to vector<2x8x8xf32>
    %277 = arith.subf %273, %276 : vector<2x8x8xf32>
    %278 = math.exp %277 : vector<2x8x8xf32>
    %cst_121 = arith.constant dense<0.000000e+00> : vector<2x8xf32>
    %279 = vector.multi_reduction <add>, %278, %cst_121 [2] : vector<2x8x8xf32> to vector<2x8xf32>
    %280 = vector.shape_cast %279 : vector<2x8xf32> to vector<2x8x1xf32>
    %281 = tpu.reciprocal %280 {approx = true} : vector<2x8x1xf32> -> vector<2x8x1xf32>
    %282 = vector.broadcast %281 : vector<2x8x1xf32> to vector<2x8x8xf32>
    %283 = arith.mulf %278, %282 : vector<2x8x8xf32>
    %284 = arith.truncf %283 : vector<2x8x8xf32> to vector<2x8x8xbf16>
    "tpu.trace_start"() <{level = 10 : i32, message = "bqk,bkd->bqd"}> : () -> ()
    %cst_122 = arith.constant dense<0.000000e+00> : vector<2x8x8xf32>
    %285 = tpu.matmul %284, %270, %cst_122 {dimension_numbers = #tpu.dot_dimension_numbers<[2], [1], [1], [2], [0, 0, 0, 1, 1, 2], [0], [0]>} : vector<2x8x8xbf16>, vector<2x8x8xbf16>, vector<2x8x8xf32> -> vector<2x8x8xf32>
    "tpu.trace_stop"() : () -> ()
    %286 = vector.extract_strided_slice %222 {offsets = [0, 24], sizes = [16, 8], strides = [1, 1]} : vector<16x96xbf16> to vector<16x8xbf16>
    %287 = vector.shape_cast %286 : vector<16x8xbf16> to vector<2x8x8xbf16>
    %288 = vector.extract_strided_slice %222 {offsets = [0, 56], sizes = [16, 8], strides = [1, 1]} : vector<16x96xbf16> to vector<16x8xbf16>
    %289 = vector.shape_cast %288 : vector<16x8xbf16> to vector<2x8x8xbf16>
    %290 = vector.extract_strided_slice %222 {offsets = [0, 88], sizes = [16, 8], strides = [1, 1]} : vector<16x96xbf16> to vector<16x8xbf16>
    %291 = vector.shape_cast %290 : vector<16x8xbf16> to vector<2x8x8xbf16>
    "tpu.trace_start"() <{level = 10 : i32, message = "bqd,bkd->bqk"}> : () -> ()
    %cst_123 = arith.constant dense<0.000000e+00> : vector<2x8x8xf32>
    %292 = tpu.matmul %287, %289, %cst_123 {dimension_numbers = #tpu.dot_dimension_numbers<[2], [2], [1], [1], [0, 0, 0, 1, 1, 1], [0], [0]>} : vector<2x8x8xbf16>, vector<2x8x8xbf16>, vector<2x8x8xf32> -> vector<2x8x8xf32>
    "tpu.trace_stop"() : () -> ()
    %293 = vector.broadcast %3 : vector<2x1x8xf32> to vector<2x8x8xf32>
    %294 = arith.addf %292, %293 : vector<2x8x8xf32>
    %cst_124 = arith.constant dense<0xFF800000> : vector<2x8xf32>
    %295 = vector.multi_reduction <maximumf>, %294, %cst_124 [2] : vector<2x8x8xf32> to vector<2x8xf32>
    %296 = vector.shape_cast %295 : vector<2x8xf32> to vector<2x8x1xf32>
    %297 = vector.broadcast %296 : vector<2x8x1xf32> to vector<2x8x8xf32>
    %298 = arith.subf %294, %297 : vector<2x8x8xf32>
    %299 = math.exp %298 : vector<2x8x8xf32>
    %cst_125 = arith.constant dense<0.000000e+00> : vector<2x8xf32>
    %300 = vector.multi_reduction <add>, %299, %cst_125 [2] : vector<2x8x8xf32> to vector<2x8xf32>
    %301 = vector.shape_cast %300 : vector<2x8xf32> to vector<2x8x1xf32>
    %302 = tpu.reciprocal %301 {approx = true} : vector<2x8x1xf32> -> vector<2x8x1xf32>
    %303 = vector.broadcast %302 : vector<2x8x1xf32> to vector<2x8x8xf32>
    %304 = arith.mulf %299, %303 : vector<2x8x8xf32>
    %305 = arith.truncf %304 : vector<2x8x8xf32> to vector<2x8x8xbf16>
    "tpu.trace_start"() <{level = 10 : i32, message = "bqk,bkd->bqd"}> : () -> ()
    %cst_126 = arith.constant dense<0.000000e+00> : vector<2x8x8xf32>
    %306 = tpu.matmul %305, %291, %cst_126 {dimension_numbers = #tpu.dot_dimension_numbers<[2], [1], [1], [2], [0, 0, 0, 1, 1, 2], [0], [0]>} : vector<2x8x8xbf16>, vector<2x8x8xbf16>, vector<2x8x8xf32> -> vector<2x8x8xf32>
    "tpu.trace_stop"() : () -> ()
    %307 = tpu.concatenate %243, %264, %285, %306 in 2 : vector<2x8x8xf32>, vector<2x8x8xf32>, vector<2x8x8xf32>, vector<2x8x8xf32> -> vector<2x8x32xf32>
    %308 = vector.shape_cast %307 : vector<2x8x32xf32> to vector<16x32xf32>
    %309 = arith.truncf %308 : vector<16x32xf32> to vector<16x32xbf16>
    %cst_127 = arith.constant dense<0.000000e+00> : vector<16x32xf32>
    %310 = tpu.matmul %309, %199, %cst_127 {dimension_numbers = #tpu.dot_dimension_numbers<[1], [0], [0], [1], [0, 0, 1, 1], [], []>} : vector<16x32xbf16>, vector<32x32xbf16>, vector<16x32xf32> -> vector<16x32xf32>
    %311 = vector.broadcast %201 : vector<1x32xf32> to vector<16x32xf32>
    %312 = arith.addf %310, %311 : vector<16x32xf32>
    %313 = arith.addf %193, %312 : vector<16x32xf32>
    %cst_128 = arith.constant dense<0.000000e+00> : vector<16xf32>
    %314 = vector.multi_reduction <add>, %313, %cst_128 [1] : vector<16x32xf32> to vector<16xf32>
    %315 = vector.shape_cast %314 : vector<16xf32> to vector<16x1xf32>
    %cst_129 = arith.constant 3.200000e+01 : f32
    %316 = vector.broadcast %cst_129 : f32 to vector<16x1xf32>
    %317 = arith.divf %315, %316 : vector<16x1xf32>
    %318 = vector.broadcast %317 : vector<16x1xf32> to vector<16x32xf32>
    %319 = arith.subf %313, %318 : vector<16x32xf32>
    %320 = vector.broadcast %317 : vector<16x1xf32> to vector<16x32xf32>
    %321 = arith.subf %313, %320 : vector<16x32xf32>
    %322 = arith.mulf %319, %321 : vector<16x32xf32>
    %cst_130 = arith.constant dense<0.000000e+00> : vector<16xf32>
    %323 = vector.multi_reduction <add>, %322, %cst_130 [1] : vector<16x32xf32> to vector<16xf32>
    %324 = vector.shape_cast %323 : vector<16xf32> to vector<16x1xf32>
    %cst_131 = arith.constant 3.200000e+01 : f32
    %325 = vector.broadcast %cst_131 : f32 to vector<16x1xf32>
    %326 = arith.divf %324, %325 : vector<16x1xf32>
    %cst_132 = arith.constant 9.99999974E-6 : f32
    %327 = vector.broadcast %cst_132 : f32 to vector<16x1xf32>
    %328 = arith.addf %326, %327 : vector<16x1xf32>
    %329 = math.rsqrt %328 : vector<16x1xf32>
    %330 = vector.broadcast %317 : vector<16x1xf32> to vector<16x32xf32>
    %331 = arith.subf %313, %330 : vector<16x32xf32>
    %332 = vector.broadcast %329 : vector<16x1xf32> to vector<16x32xf32>
    %333 = arith.mulf %331, %332 : vector<16x32xf32>
    %334 = vector.broadcast %203 : vector<1x32xf32> to vector<16x32xf32>
    %335 = arith.mulf %333, %334 : vector<16x32xf32>
    %336 = vector.broadcast %205 : vector<1x32xf32> to vector<16x32xf32>
    %337 = arith.addf %335, %336 : vector<16x32xf32>
    %338 = arith.truncf %337 : vector<16x32xf32> to vector<16x32xbf16>
    %cst_133 = arith.constant dense<0.000000e+00> : vector<16x128xf32>
    %339 = tpu.matmul %338, %207, %cst_133 {dimension_numbers = #tpu.dot_dimension_numbers<[1], [0], [0], [1], [0, 0, 1, 1], [], []>} : vector<16x32xbf16>, vector<32x128xbf16>, vector<16x128xf32> -> vector<16x128xf32>
    %340 = vector.broadcast %209 : vector<1x128xf32> to vector<16x128xf32>
    %341 = arith.addf %339, %340 : vector<16x128xf32>
    %cst_134 = arith.constant 5.000000e-01 : f32
    %342 = vector.broadcast %cst_134 : f32 to vector<16x128xf32>
    %343 = arith.mulf %342, %341 : vector<16x128xf32>
    %cst_135 = arith.constant 4.471500e-02 : f32
    %344 = vector.broadcast %cst_135 : f32 to vector<16x128xf32>
    %345 = arith.mulf %344, %341 : vector<16x128xf32>
    %346 = arith.mulf %345, %341 : vector<16x128xf32>
    %347 = arith.mulf %346, %341 : vector<16x128xf32>
    %348 = arith.addf %341, %347 : vector<16x128xf32>
    %cst_136 = arith.constant 0.797884583 : f32
    %349 = vector.broadcast %cst_136 : f32 to vector<16x128xf32>
    %350 = arith.mulf %349, %348 : vector<16x128xf32>
    %351 = math.tanh %350 : vector<16x128xf32>
    %cst_137 = arith.constant 1.000000e+00 : f32
    %352 = vector.broadcast %cst_137 : f32 to vector<16x128xf32>
    %353 = arith.addf %352, %351 : vector<16x128xf32>
    %354 = arith.mulf %343, %353 : vector<16x128xf32>
    %355 = arith.truncf %354 : vector<16x128xf32> to vector<16x128xbf16>
    %cst_138 = arith.constant dense<0.000000e+00> : vector<16x32xf32>
    %356 = tpu.matmul %355, %211, %cst_138 {dimension_numbers = #tpu.dot_dimension_numbers<[1], [0], [0], [1], [0, 0, 1, 1], [], []>} : vector<16x128xbf16>, vector<128x32xbf16>, vector<16x32xf32> -> vector<16x32xf32>
    %357 = vector.broadcast %213 : vector<1x32xf32> to vector<16x32xf32>
    %358 = arith.addf %356, %357 : vector<16x32xf32>
    %359 = arith.addf %337, %358 : vector<16x32xf32>
    %cst_139 = arith.constant dense<0.000000e+00> : vector<16xf32>
    %360 = vector.multi_reduction <add>, %359, %cst_139 [1] : vector<16x32xf32> to vector<16xf32>
    %361 = vector.shape_cast %360 : vector<16xf32> to vector<16x1xf32>
    %cst_140 = arith.constant 3.200000e+01 : f32
    %362 = vector.broadcast %cst_140 : f32 to vector<16x1xf32>
    %363 = arith.divf %361, %362 : vector<16x1xf32>
    %364 = vector.broadcast %363 : vector<16x1xf32> to vector<16x32xf32>
    %365 = arith.subf %359, %364 : vector<16x32xf32>
    %366 = vector.broadcast %363 : vector<16x1xf32> to vector<16x32xf32>
    %367 = arith.subf %359, %366 : vector<16x32xf32>
    %368 = arith.mulf %365, %367 : vector<16x32xf32>
    %cst_141 = arith.constant dense<0.000000e+00> : vector<16xf32>
    %369 = vector.multi_reduction <add>, %368, %cst_141 [1] : vector<16x32xf32> to vector<16xf32>
    %370 = vector.shape_cast %369 : vector<16xf32> to vector<16x1xf32>
    %cst_142 = arith.constant 3.200000e+01 : f32
    %371 = vector.broadcast %cst_142 : f32 to vector<16x1xf32>
    %372 = arith.divf %370, %371 : vector<16x1xf32>
    %cst_143 = arith.constant 9.99999974E-6 : f32
    %373 = vector.broadcast %cst_143 : f32 to vector<16x1xf32>
    %374 = arith.addf %372, %373 : vector<16x1xf32>
    %375 = math.rsqrt %374 : vector<16x1xf32>
    %376 = vector.broadcast %363 : vector<16x1xf32> to vector<16x32xf32>
    %377 = arith.subf %359, %376 : vector<16x32xf32>
    %378 = vector.broadcast %375 : vector<16x1xf32> to vector<16x32xf32>
    %379 = arith.mulf %377, %378 : vector<16x32xf32>
    %380 = vector.broadcast %215 : vector<1x32xf32> to vector<16x32xf32>
    %381 = arith.mulf %379, %380 : vector<16x32xf32>
    %382 = vector.broadcast %217 : vector<1x32xf32> to vector<16x32xf32>
    %383 = arith.addf %381, %382 : vector<16x32xf32>
    %c0_144 = arith.constant 0 : index
    %c0_145 = arith.constant 0 : index
    %384 = vector.load %arg15[%c0_144, %c0_145] : memref<16x32xf32, #tpu.memory_space<vmem>>, vector<16x32xf32>
    tpu.vector_store %arg15[%c0_144, %c0_145], %383 {strides = array<i32>} : memref<16x32xf32, #tpu.memory_space<vmem>>, vector<16x32xf32>,
    return
  }
}

</mosaic_0001>

<bundles_post_ra>
// kernel: tpu_custom_call.1
= control target key start
LH: loop header
LB: loop body
LE: loop exit
PB: predicated region body
PF: predicated region fallthrough
CT: control target
= control target key end

     0   :  { %vm112_vm0 = vcmask 261120   ;;  %s2722_s0 = inlined_call_operand.vmem [shape: f32[16,32], index: 0, kind: input, shape index: {}]   ;;  %s2723_s1 = inlined_call_operand.vmem [shape: f32[16,32], index: 1, kind: input, shape index: {}]   ;;  %s2724_s2 = inlined_call_operand.vmem [shape: f32[2,1,8], index: 2, kind: input, shape index: {}]   ;;  %s2725_s3 = inlined_call_operand.vmem [shape: bf16[2,32,96], index: 3, kind: input, shape index: {}]   ;;  %s2726_s4 = inlined_call_operand.vmem [shape: f32[2,1,96], index: 4, kind: input, shape index: {}]   ;;  %s2727_s5 = inlined_call_operand.vmem [shape: bf16[2,32,32], index: 5, kind: input, shape index: {}]   ;;  %s2728_s6 = inlined_call_operand.vmem [shape: f32[2,1,32], index: 6, kind: input, shape index: {}]   ;;  %s2729_s7 = inlined_call_operand.vmem [shape: f32[2,1,32], index: 7, kind: input, shape index: {}]   ;;  %s2730_s8 = inlined_call_operand.vmem [shape: f32[2,1,32], index: 8, kind: input, shape index: {}]   ;;  %s2731_s9 = inlined_call_operand.vmem [shape: bf16[2,32,128], index: 9, kind: input, shape index: {}]   ;;  %s2732_s10 = inlined_call_operand.vmem [shape: f32[2,1,128], index: 10, kind: input, shape index: {}]   ;;  %s2733_s11 = inlined_call_operand.vmem [shape: bf16[2,128,32], index: 11, kind: input, shape index: {}]   ;;  %s2734_s12 = inlined_call_operand.vmem [shape: f32[2,1,32], index: 12, kind: input, shape index: {}]   ;;  %s2735_s13 = inlined_call_operand.vmem [shape: f32[2,1,32], index: 13, kind: input, shape index: {}]   ;;  %s2736_s14 = inlined_call_operand.vmem [shape: f32[2,1,32], index: 14, kind: input, shape index: {}]   ;;  %s2737_s15 = inlined_call_operand.hbm [shape: f32[16,32], index: 15, kind: output, shape index: {}]  }
   0x1   :  { %v1923_v0 = vld [vmem:[%s2725_s3 + $0x8] sm:$0xff]  ;;  %v52_v1 = vld [vmem:[%s2722_s0] sm:$0xff] }
   0x2   :  { %v53_v2 = vld [vmem:[%s2722_s0 + $0x8] sm:$0xff]  ;;  %v54_v3 = vld [vmem:[%s2723_s1] sm:$0xff]  ;;  %122 = vmatpush.bf16.msra.mxu0 %v1923_v0 }
   0x3   :  { %v55_v4 = vld [vmem:[%s2723_s1 + $0x8] sm:$0xff]  ;;  %v1922_v5 = vld [vmem:[%s2725_s3] sm:$0xff]  ;;  %v2248_v6 = vadd.f32 %v54_v3, %v52_v1 }
   0x4   :  { %v2250_v7 = vadd.f32 %v55_v4, %v53_v2 }
   0x6   :  { %v96_v8 = vpack.c.bf16 %v2250_v7, %v2248_v6  ;;  %123 = vmatpush.bf16.msra.mxu0 %v1922_v5 }
   0x7   :  { %20 = vsyncpa [#allocation3], 0  ;;  %v1997_v9 = vld [vmem:[%s2726_s4] ss:$0 sm:$0xff]  ;;  %s2748_s1 = smov 64   ;;  %s2134_s16 = smov 96  }
   0x8   :  { %s2135_s17 = smov 88   ;;  %s2136_s18 = smov 120   ;;  %vm216_vm1 = vcmask 1043456   ;;  %vm143_vm2 = vcmask 64512   ;;  %v2299_v38 = vld [vmem:[%s2724_s2] ss:$0 sm:$0xff] }
   0x9   :  { %1744 = vmatmul.msk.bf16.vlgmr.msra.gmra.mxu0 %vm112_vm0, %v96_v8  ;;  %s2137_s19 = smov 80   ;;  %s2138_s20 = smov 72   ;;  %v2306_v44 = vld [vmem:[%s2724_s2 + $0x1] ss:$0 sm:$0xff]  ;;  %vm616_vm3 = vcmask 130048   ;;  %vm619_vm4 = vcmask 195584  }
   0xa   :  { %s2139_s21 = smov 104   ;;  %s2140_s26 = smov 112  }
   0xb   :  { %s2746_s27 = smov 56   ;;  %s2744_s28 = smov 48  }
   0xc   :  { %s2742_s29 = smov 40   ;;  %s2738_s0 = smov 8  }
   0xd   :  { %s2741_s30 = smov 16   ;;  %s2740_s22 = smov 24  }
  0x86   :  { %v125_v10 = vpop.f32.mrf.mxu0 }
  0x87   :  { %v126_v11 = vadd.f32 %v1997_v9, %v125_v10 }
  0x89   :  { %v130_v12 = vpack.c.bf16 %v126_v11, %v126_v11 }
  0x8b   :  { %v139_v13 = vunpack.c.l.b16 %v130_v12 }
  0x8d   :  { %v2258_v14 = vpack.c.b16 %v139_v13, %v139_v13 }
  0x8e   :  { %v127_v15 = vpop.f32.mrf.mxu0 }
  0x8f   :  { %v128_v16 = vadd.f32 %v1997_v9, %v127_v15  ;;  %211 = vrot.lane.b32.xlu2 %v2258_v14, %s2748_s1  ;;  %141 = vrot.lane.b32.xlu0 %v2258_v14, %s2134_s16 }
  0x91   :  { %v131_v17 = vpack.c.bf16 %v128_v16, %v128_v16 }
  0x93   :  { %v164_v18 = vunpack.c.l.b16 %v131_v17 }
  0x95   :  { %v2264_v19 = vpack.c.b16 %v164_v18, %v164_v18 }
  0x97   :  { %166 = vrot.lane.b32.xlu1 %v2264_v19, %s2134_s16  ;;  %256 = vrot.lane.b32.xlu2 %v2258_v14, %s2135_s17 }
  0x9f   :  { %279 = vrot.lane.b32.xlu2 %v2264_v19, %s2135_s17 }
  0xa7   :  { %254 = vrot.lane.b32.xlu2 %v2258_v14, %s2136_s18 }
  0xaf   :  { %277 = vrot.lane.b32.xlu2 %v2264_v19, %s2136_s18 }
  0xb7   :  { %368 = vrot.lane.b32.xlu2 %v2258_v14, %s2137_s19 }
  0xbf   :  { %391 = vrot.lane.b32.xlu2 %v2264_v19, %s2137_s19 }
  0xc7   :  { %480 = vrot.lane.b32.xlu2 %v2258_v14, %s2138_s20 }
  0xcf   :  { %503 = vrot.lane.b32.xlu2 %v2264_v19, %s2138_s20 }
  0xd7   :  { %501 = vrot.lane.b32.xlu2 %v2264_v19, %s2139_s21 }
  0xe9   :  { %v212_v20 = vpop.permute.xlu2 %211 }
  0xea   :  { %v218_v21 = vsel %vm216_vm1, %v212_v20, 0 }
  0xeb   :  { %227 = vmatpush.bf16.msrb.mxu0 %v218_v21 }
  0xf1   :  { %v257_v22 = vpop.permute.xlu2 %256 }
  0xf2   :  { %v262_v23 = vsel %vm143_vm2, %v257_v22, 0 }
  0xf3   :  { %271 = vmatpush.bf16.xpose.msra.mxu0 %v262_v23 }
  0xf9   :  { %v280_v24 = vpop.permute.xlu2 %279 }
  0xfa   :  { %v285_v28 = vsel %vm143_vm2, %v280_v24, 0 }
 0x101   :  { %v255_v25 = vpop.permute.xlu2 %254  ;;  %v142_v26 = vpop.permute.xlu0 %141 }
 0x102   :  { %v148_v27 = vsel %vm143_vm2, %v142_v26, 0 }
 0x103   :  { %157 = vmatpush.bf16.xpose.msra.mxu1 %v148_v27 }
 0x109   :  { %v167_v29 = vpop.permute.xlu1 %166  ;;  %v278_v30 = vpop.permute.xlu2 %277 }
 0x10a   :  { %1745 = vmatmul.msk.bf16.vlgmr.msra.gmra.mxu1 %vm143_vm2, %v130_v12  ;;  %v172_v31 = vsel %vm143_vm2, %v167_v29, 0 }
 0x10b   :  { %294 = vmatpush.bf16.xpose.msrb.mxu1 %v285_v28  ;;  %181 = vmatpush.bf16.xpose.msra.mxu2 %v172_v31 }
 0x111   :  { %v369_v32 = vpop.permute.xlu2 %368 }
 0x112   :  { %1746 = vmatmul.msk.bf16.vlgmr.msra.gmra.mxu2 %vm143_vm2, %v131_v17  ;;  %v374_v61 = vsel %vm143_vm2, %v369_v32, 0 }
 0x119   :  { %v392_v33 = vpop.permute.xlu2 %391 }
 0x11a   :  { %v397_v34 = vsel %vm143_vm2, %v392_v33, 0  ;;  %1750 = vmatmul.msk.bf16.vlgmr.msrb.gmra.mxu1 %vm143_vm2, %v278_v30 }
 0x11b   :  { %406 = vmatpush.bf16.xpose.msra.mxu1 %v397_v34 }
 0x121   :  { %v481_v35 = vpop.permute.xlu2 %480 }
 0x122   :  { %v486_v63 = vsel %vm143_vm2, %v481_v35, 0 }
 0x129   :  { %v504_v36 = vpop.permute.xlu2 %503 }
 0x12a   :  { %v509_v37 = vsel %vm143_vm2, %v504_v36, 0 }
 0x12b   :  { %518 = vmatpush.bf16.xpose.msrb.mxu1 %v509_v37 }
 0x131   :  { %v502_v0 = vpop.permute.xlu2 %501 }
 0x187   :  { %v159_v39 = vpop.f32.mrf.mxu1 }
 0x188   :  { %v160_v40 = vadd.f32 %v2299_v38, %v159_v39 }
 0x18a   :  { %v187_v41 = vsel %vm143_vm2, %v160_v40, -inf }
 0x18b   :  { %188 = vmax.xlane.f32.xlu0 %v187_v41 }
 0x18f   :  { %v161_v42 = vpop.f32.mrf.mxu1 }
 0x195   :  { %v183_v43 = vpop.f32.mrf.mxu2 }
 0x196   :  { %v184_v55 = vadd.f32 %v2306_v44, %v183_v43 }
 0x197   :  { %v296_v45 = vpop.f32.mrf.mxu1 }
 0x198   :  { %v297_v46 = vadd.f32 %v2306_v44, %v296_v45  ;;  %v190_v56 = vsel %vm143_vm2, %v184_v55, -inf }
 0x19a   :  { %v303_v47 = vsel %vm143_vm2, %v297_v46, -inf }
 0x19b   :  { %304 = vmax.xlane.f32.xlu2 %v303_v47 }
 0x19d   :  { %v185_v48 = vpop.f32.mrf.mxu2 }
 0x19f   :  { %v298_v49 = vpop.f32.mrf.mxu1  ;;  %366 = vrot.lane.b32.xlu0 %v2258_v14, %s2140_s26 }
 0x1a7   :  { %478 = vrot.lane.b32.xlu0 %v2258_v14, %s2139_s21 }
 0x1fe   :  { %v189_v50 = vpop.xlane.xlu0 %188 }
 0x1ff   :  { %v193_v51 = vsub.f32 %v160_v40, %v189_v50 }
 0x201   :  { %v195_v52 = vmul.f32 1.442695, %v193_v51 }
 0x203   :  { %2015 = vpow2.f32 %v195_v52 }
 0x209   :  { %v2016_v53 = vpop.eup %2015 }
 0x20a   :  { %v199_v54 = vsel %vm143_vm2, %v2016_v53, 0.0 }
 0x20b   :  { %200 = vadd.xlane.f32.xlu1 %v199_v54 }
 0x20e   :  { %v305_v15 = vpop.xlane.xlu2 %304 }
 0x20f   :  { %v307_v18 = vsub.f32 %v297_v46, %v305_v15 }
 0x211   :  { %v367_v1 = vpop.permute.xlu0 %366  ;;  %v310_v22 = vmul.f32 1.442695, %v307_v18 }
 0x219   :  { %v479_v2 = vpop.permute.xlu0 %478 }
 0x224   :  { %389 = vrot.lane.b32.xlu1 %v2264_v19, %s2140_s26 }
 0x24e   :  { %191 = vmax.xlane.f32.xlu1 %v190_v56 }
 0x27e   :  { %v201_v57 = vpop.xlane.xlu1 %200 }
 0x27f   :  { %2017 = vrcp.f32 %v201_v57 }
 0x285   :  { %v2018_v58 = vpop.eup %2017 }
 0x286   :  { %v207_v59 = vmul.f32 %v2018_v58, %v2016_v53 }
 0x288   :  { %v209_v60 = vpack.c.bf16 %v207_v59, %v207_v59 }
 0x28a   :  { %1747 = vmatmul.msk.bf16.vlgmr.msrb.gmra.mxu0 %vm143_vm2, %v209_v60 }
 0x28b   :  { %383 = vmatpush.bf16.xpose.msrb.mxu0 %v374_v61 }
 0x296   :  { %v390_v62 = vpop.permute.xlu1 %389 }
 0x297   :  { %1754 = vmatmul.msk.bf16.vlgmr.msra.gmra.mxu1 %vm143_vm2, %v390_v62 }
 0x29a   :  { %1749 = vmatmul.msk.bf16.vlgmr.msra.gmra.mxu0 %vm143_vm2, %v255_v25 }
 0x29b   :  { %495 = vmatpush.bf16.xpose.msra.mxu0 %v486_v63 }
 0x2a7   :  { %1758 = vmatmul.msk.bf16.vlgmr.msrb.gmra.mxu1 %vm143_vm2, %v502_v0 }
 0x2aa   :  { %1753 = vmatmul.msk.bf16.vlgmr.msrb.gmra.mxu0 %vm143_vm2, %v367_v1 }
 0x2ba   :  { %1757 = vmatmul.msk.bf16.vlgmr.msra.gmra.mxu0 %vm143_vm2, %v479_v2 }
 0x2c1   :  { %v192_v4 = vpop.xlane.xlu1 %191 }
 0x2c2   :  { %v194_v5 = vsub.f32 %v184_v55, %v192_v4 }
 0x2c4   :  { %v197_v9 = vmul.f32 1.442695, %v194_v5 }
 0x2c6   :  { %2019 = vpow2.f32 %v197_v9 }
 0x2c7   :  { %2021 = vpow2.f32 %v310_v22 }
 0x2cc   :  { %v2331_v16 = vpop.eup %2019 }
 0x2cd   :  { %v202_v21 = vsel %vm143_vm2, %v2331_v16, 0.0  ;;  %v2340_v30 = vpop.eup %2021 }
 0x2ce   :  { %v315_v33 = vsel %vm143_vm2, %v2340_v30, 0.0 }
 0x307   :  { %v2327_v3 = vpop.f32.mrf.mxu0 }
 0x30f   :  { %v231_v8 = vpop.f32.mrf.mxu0 }
 0x314   :  { %v408_v10 = vpop.f32.mrf.mxu1 }
 0x315   :  { %v409_v11 = vadd.f32 %v2306_v44, %v408_v10 }
 0x317   :  { %v273_v12 = vpop.f32.mrf.mxu0  ;;  %v415_v13 = vsel %vm143_vm2, %v409_v11, -inf }
 0x318   :  { %416 = vmax.xlane.f32.xlu0 %v415_v13  ;;  %v274_v23 = vadd.f32 %v2299_v38, %v273_v12 }
 0x31a   :  { %v300_v28 = vsel %vm143_vm2, %v274_v23, -inf }
 0x31c   :  { %v410_v17 = vpop.f32.mrf.mxu1 }
 0x31f   :  { %v275_v20 = vpop.f32.mrf.mxu0 }
 0x320   :  { %203 = vadd.xlane.f32.xlu0 %v202_v21 }
 0x324   :  { %v520_v24 = vpop.f32.mrf.mxu1 }
 0x325   :  { %v521_v25 = vadd.f32 %v2306_v44, %v520_v24 }
 0x327   :  { %v385_v26 = vpop.f32.mrf.mxu0  ;;  %v527_v27 = vsel %vm143_vm2, %v521_v25, -inf }
 0x328   :  { %528 = vmax.xlane.f32.xlu1 %v527_v27  ;;  %301 = vmax.xlane.f32.xlu0 %v300_v28  ;;  %v386_v29 = vadd.f32 %v2299_v38, %v385_v26 }
 0x32a   :  { %v412_v34 = vsel %vm143_vm2, %v386_v29, -inf }
 0x32c   :  { %v522_v31 = vpop.f32.mrf.mxu1 }
 0x32f   :  { %v387_v32 = vpop.f32.mrf.mxu0 }
 0x330   :  { %316 = vadd.xlane.f32.xlu0 %v315_v33  ;;  %413 = vmax.xlane.f32.xlu1 %v412_v34 }
 0x337   :  { %v497_v35 = vpop.f32.mrf.mxu0 }
 0x338   :  { %v2346_v36 = vadd.f32 %v2299_v38, %v497_v35 }
 0x33a   :  { %v524_v37 = vsel %vm143_vm2, %v2346_v36, -inf }
 0x33b   :  { %525 = vmax.xlane.f32.xlu2 %v524_v37 }
 0x33f   :  { %v499_v39 = vpop.f32.mrf.mxu0 }
 0x344   :  { %345 = vrot.lane.b32.xlu0 %v2264_v19, %s2746_s27 }
 0x349   :  { %324 = vrot.lane.b32.xlu1 %v2258_v14, %s2746_s27  ;;  %s2755_s27 = smov 16  }
 0x351   :  { %436 = vrot.lane.b32.xlu1 %v2258_v14, %s2744_s28 }
 0x353   :  { %233 = vrot.lane.b32.xlu2 %v2264_v19, %s2748_s1 }
 0x38b   :  { %v417_v40 = vpop.xlane.xlu0 %416 }
 0x38c   :  { %v419_v41 = vsub.f32 %v409_v11, %v417_v40 }
 0x38e   :  { %v422_v42 = vmul.f32 1.442695, %v419_v41 }
 0x390   :  { %2023 = vpow2.f32 %v422_v42 }
 0x393   :  { %v204_v43 = vpop.xlane.xlu0 %203 }
 0x396   :  { %v2358_v45 = vpop.eup %2023 }
 0x397   :  { %v427_v46 = vsel %vm143_vm2, %v2358_v45, 0.0 }
 0x398   :  { %428 = vadd.xlane.f32.xlu0 %v427_v46 }
 0x39b   :  { %v529_v47 = vpop.xlane.xlu1 %528  ;;  %v302_v48 = vpop.xlane.xlu0 %301 }
 0x39c   :  { %v306_v49 = vsub.f32 %v274_v23, %v302_v48  ;;  %v531_v53 = vsub.f32 %v521_v25, %v529_v47 }
 0x39e   :  { %v308_v50 = vmul.f32 1.442695, %v306_v49  ;;  %v534_v57 = vmul.f32 1.442695, %v531_v53 }
 0x3a0   :  { %2025 = vpow2.f32 %v308_v50 }
 0x3a3   :  { %v414_v51 = vpop.xlane.xlu1 %413  ;;  %v317_v59 = vpop.xlane.xlu0 %316 }
 0x3a4   :  { %v418_v52 = vsub.f32 %v386_v29, %v414_v51 }
 0x3a6   :  { %v420_v54 = vmul.f32 1.442695, %v418_v52  ;;  %v2026_v55 = vpop.eup %2025 }
 0x3a7   :  { %v312_v56 = vsel %vm143_vm2, %v2026_v55, 0.0 }
 0x3a8   :  { %2027 = vpow2.f32 %v420_v54  ;;  %313 = vadd.xlane.f32.xlu1 %v312_v56 }
 0x3a9   :  { %2029 = vrcp.f32 %v204_v43 }
 0x3aa   :  { %2031 = vpow2.f32 %v534_v57 }
 0x3ab   :  { %2033 = vrcp.f32 %v317_v59 }
 0x3ac   :  { %569 = vrot.lane.b32.xlu0 %v2264_v19, %s2742_s29 }
 0x3ae   :  { %v2028_v58 = vpop.eup %2027  ;;  %v526_v60 = vpop.xlane.xlu2 %525 }
 0x3af   :  { %v424_v61 = vsel %vm143_vm2, %v2028_v58, 0.0  ;;  %v2030_v62 = vpop.eup %2029  ;;  %v530_v18 = vsub.f32 %v2346_v36, %v526_v60 }
 0x3b0   :  { %425 = vadd.xlane.f32.xlu2 %v424_v61  ;;  %v2032_v63 = vpop.eup %2031  ;;  %v208_v0 = vmul.f32 %v2030_v62, %v2331_v16 }
 0x3b1   :  { %v539_v4 = vsel %vm143_vm2, %v2032_v63, 0.0  ;;  %v2034_v12 = vpop.eup %2033  ;;  %v532_v20 = vmul.f32 1.442695, %v530_v18 }
 0x3b2   :  { %v210_v9 = vpack.c.bf16 %v208_v0, %v208_v0  ;;  %v321_v16 = vmul.f32 %v2034_v12, %v2340_v30 }
 0x3b3   :  { %2035 = vpow2.f32 %v532_v20 }
 0x3b4   :  { %v323_v17 = vpack.c.bf16 %v321_v16, %v321_v16 }
 0x3b6   :  { %v234_v1 = vpop.permute.xlu2 %233  ;;  %v346_v2 = vpop.permute.xlu0 %345 }
 0x3b7   :  { %v239_v5 = vsel %vm216_vm1, %v234_v1, 0  ;;  %v351_v8 = vsel %vm216_vm1, %v346_v2, 0  ;;  %v1925_v2 = vld [vmem:[%s2727_s5 + $0x8] sm:$0xff] }
 0x3b8   :  { %540 = vadd.xlane.f32.xlu2 %v539_v4  ;;  %248 = vmatpush.bf16.msra.mxu3 %v239_v5  ;;  %v1924_v4 = vld [vmem:[%s2727_s5] sm:$0xff] }
 0x3b9   :  { %v2036_v21 = vpop.eup %2035  ;;  %647 = vmatpush.bf16.msrb.mxu0 %v1925_v2 }
 0x3ba   :  { %v536_v22 = vsel %vm143_vm2, %v2036_v21, 0.0 }
 0x3bb   :  { %v325_v10 = vpop.permute.xlu1 %324  ;;  %1748 = vmatmul.msk.bf16.vlgmr.msra.gmra.mxu3 %vm143_vm2, %v210_v9 }
 0x3bc   :  { %360 = vmatpush.bf16.msrb.mxu3 %v351_v8  ;;  %v330_v11 = vsel %vm216_vm1, %v325_v10, 0 }
 0x3bd   :  { %339 = vmatpush.bf16.msrb.mxu2 %v330_v11  ;;  %648 = vmatpush.bf16.msrb.mxu0 %v1924_v4 }
 0x3c1   :  { %457 = vrot.lane.b32.xlu1 %v2264_v19, %s2744_s28 }
 0x3c3   :  { %v437_v13 = vpop.permute.xlu1 %436 }
 0x3c4   :  { %v442_v15 = vsel %vm216_vm1, %v437_v13, 0 }
 0x3c5   :  { %451 = vmatpush.bf16.msra.mxu2 %v442_v15 }
 0x3cb   :  { %1752 = vmatmul.msk.bf16.vlgmr.msrb.gmra.mxu3 %vm143_vm2, %v323_v17 }
 0x3d0   :  { %548 = vrot.lane.b32.xlu2 %v2258_v14, %s2742_s29 }
 0x3eb   :  { %537 = vadd.xlane.f32.xlu1 %v536_v22 }
 0x40b   :  { %v429_v27 = vpop.xlane.xlu0 %428 }
 0x41b   :  { %v314_v19 = vpop.xlane.xlu1 %313 }
 0x41c   :  { %2037 = vrcp.f32 %v314_v19 }
 0x41e   :  { %v570_v32 = vpop.permute.xlu0 %569 }
 0x41f   :  { %v575_v37 = vsel %vm216_vm1, %v570_v32, 0 }
 0x422   :  { %v2038_v23 = vpop.eup %2037 }
 0x423   :  { %v426_v24 = vpop.xlane.xlu2 %425  ;;  %v320_v25 = vmul.f32 %v2038_v23, %v2026_v55 }
 0x424   :  { %2039 = vrcp.f32 %v426_v24  ;;  %v2000_v24 = vld [vmem:[%s2728_s6] ss:$0 sm:$0xff] }
 0x425   :  { %v322_v26 = vpack.c.bf16 %v320_v25, %v320_v25  ;;  %2041 = vrcp.f32 %v429_v27 }
 0x427   :  { %1751 = vmatmul.msk.bf16.vlgmr.msrb.gmra.mxu2 %vm143_vm2, %v322_v26 }
 0x42a   :  { %v2040_v28 = vpop.eup %2039 }
 0x42b   :  { %v541_v14 = vpop.xlane.xlu2 %540  ;;  %v2042_v29 = vpop.eup %2041  ;;  %v432_v30 = vmul.f32 %v2040_v28, %v2028_v58 }
 0x42c   :  { %v433_v31 = vmul.f32 %v2042_v29, %v2358_v45  ;;  %2043 = vrcp.f32 %v541_v14 }
 0x42d   :  { %v434_v39 = vpack.c.bf16 %v432_v30, %v432_v30 }
 0x42e   :  { %v435_v40 = vpack.c.bf16 %v433_v31, %v433_v31  ;;  %v2147_v31 = vmov 32.0  }
 0x432   :  { %v2044_v42 = vpop.eup %2043 }
 0x433   :  { %v549_v33 = vpop.permute.xlu2 %548  ;;  %v458_v35 = vpop.permute.xlu1 %457  ;;  %v545_v43 = vmul.f32 %v2044_v42, %v2032_v63 }
 0x434   :  { %v554_v34 = vsel %vm216_vm1, %v549_v33, 0  ;;  %v463_v36 = vsel %vm216_vm1, %v458_v35, 0 }
 0x435   :  { %563 = vmatpush.bf16.msrb.mxu2 %v554_v34  ;;  %472 = vmatpush.bf16.msra.mxu3 %v463_v36  ;;  %v547_v46 = vpack.c.bf16 %v545_v43, %v545_v43 }
 0x437   :  { %1755 = vmatmul.msk.bf16.vlgmr.msra.gmra.mxu2 %vm143_vm2, %v434_v39 }
 0x438   :  { %1756 = vmatmul.msk.bf16.vlgmr.msra.gmra.mxu3 %vm143_vm2, %v435_v40 }
 0x439   :  { %584 = vmatpush.bf16.msrb.mxu3 %v575_v37 }
 0x43e   :  { %v250_v41 = vpop.f32.mrf.mxu3 }
 0x446   :  { %v252_v45 = vpop.f32.mrf.mxu3 }
 0x448   :  { %1760 = vmatmul.msk.bf16.vlgmr.msrb.gmra.mxu3 %vm143_vm2, %v547_v46 }
 0x44e   :  { %v362_v47 = vpop.f32.mrf.mxu3 }
 0x456   :  { %v364_v48 = vpop.f32.mrf.mxu3 }
 0x457   :  { %v1927_v48 = vld [vmem:[%s2731_s9 + $0x8] sm:$0xff] }
 0x458   :  { %743 = vmatpush.bf16.msra.mxu1 %v1927_v48 }
 0x45e   :  { %v538_v49 = vpop.xlane.xlu1 %537 }
 0x45f   :  { %2045 = vrcp.f32 %v538_v49 }
 0x460   :  { %2047 = vrcp.f32 %v2147_v31 }
 0x465   :  { %v2046_v50 = vpop.eup %2045 }
 0x466   :  { %v544_v51 = vmul.f32 %v2046_v50, %v2036_v21  ;;  %v2048_v32 = vpop.eup %2047 }
 0x467   :  { %v664_v33 = vmul.f32 32.0, %v2048_v32  ;;  %vm668_vm5 = vweird.f32 %v2048_v32 }
 0x468   :  { %v546_v52 = vpack.c.bf16 %v544_v51, %v544_v51  ;;  %v1926_v51 = vld [vmem:[%s2731_s9] sm:$0xff] }
 0x469   :  { %v665_v34 = vsub.f32 1.0, %v664_v33  ;;  %744 = vmatpush.bf16.msra.mxu1 %v1926_v51 }
 0x46a   :  { %1759 = vmatmul.msk.bf16.vlgmr.msrb.gmra.mxu2 %vm143_vm2, %v546_v52 }
 0x46b   :  { %v666_v35 = vmul.f32 %v2048_v32, %v665_v34 }
 0x46d   :  { %v667_v36 = vadd.f32 %v2048_v32, %v666_v35 }
 0x46f   :  { %v2414_v37 = vsel %vm668_vm5, %v2048_v32, %v667_v36 }
 0x4aa   :  { %v341_v53 = vpop.f32.mrf.mxu2 }
 0x4ab   :  { %v1967_v54 = vpack.i.bf16 %v362_v47, %v341_v53 }
 0x4ad   :  { %1968 = vrot.lane.b32.xlu1 %v1967_v54, %s2738_s0 }
 0x4b2   :  { %v343_v55 = vpop.f32.mrf.mxu2 }
 0x4ba   :  { %v453_v56 = vpop.f32.mrf.mxu2 }
 0x4bb   :  { %v474_v57 = vpop.f32.mrf.mxu3 }
 0x4bc   :  { %v1972_v58 = vpack.i.bf16 %v474_v57, %v453_v56 }
 0x4be   :  { %1973 = vrot.lane.b32.xlu0 %v1972_v58, %s2741_s30 }
 0x4c2   :  { %v455_v59 = vpop.f32.mrf.mxu2 }
 0x4c3   :  { %v476_v60 = vpop.f32.mrf.mxu3 }
 0x4cb   :  { %v586_v61 = vpop.f32.mrf.mxu3 }
 0x4d3   :  { %v588_v62 = vpop.f32.mrf.mxu3 }
 0x4ed   :  { %v565_v63 = vpop.f32.mrf.mxu2 }
 0x4ee   :  { %v1977_v0 = vpack.i.bf16 %v586_v61, %v565_v63 }
 0x4f0   :  { %1978 = vrot.lane.b32.xlu2 %v1977_v0, %s2740_s22  ;;  %s2756_s22 = smov 24  }
 0x4f5   :  { %v567_v1 = vpop.f32.mrf.mxu2 }
 0x51f   :  { %v1969_v5 = vpop.permute.xlu1 %1968 }
 0x520   :  { %v1971_v9 = vunpack.i.h.bf16 %v1969_v5  ;;  %v1970_v10 = vunpack.i.l.bf16 %v1969_v5  ;;  %v2001_v5 = vld [vmem:[%s2729_s7] ss:$0 sm:$0xff] }
 0x522   :  { %v615_v15 = vsel %vm143_vm2, %v250_v41, %v1971_v9  ;;  %v614_v16 = vsel %vm143_vm2, %v2327_v3, %v1970_v10 }
 0x530   :  { %v1974_v8 = vpop.permute.xlu0 %1973 }
 0x531   :  { %v1976_v11 = vunpack.i.h.bf16 %v1974_v8  ;;  %v1975_v12 = vunpack.i.l.bf16 %v1974_v8 }
 0x533   :  { %v618_v20 = vsel %vm616_vm3, %v615_v15, %v1976_v11  ;;  %v617_v21 = vsel %vm616_vm3, %v614_v16, %v1975_v12  ;;  %v2002_v11 = vld [vmem:[%s2730_s8] ss:$0 sm:$0xff] }
 0x54a   :  { %v1979_v13 = vpop.permute.xlu2 %1978 }
 0x54b   :  { %v1981_v17 = vunpack.i.h.bf16 %v1979_v13  ;;  %v1980_v18 = vunpack.i.l.bf16 %v1979_v13 }
 0x54d   :  { %v620_v22 = vsel %vm619_vm4, %v617_v21, %v1980_v18  ;;  %v621_v19 = vsel %vm619_vm4, %v618_v20, %v1981_v17  ;;  %v1935_v20 = vld [vmem:[%s2733_s11 + $0x38] sm:$0xff]  ;;  %v1934_v21 = vld [vmem:[%s2733_s11 + $0x30] sm:$0xff] }
 0x54e   :  { %v622_v23 = vpack.c.bf16 %v621_v19, %v620_v22  ;;  %821 = vmatpush.bf16.msra.mxu2 %v1935_v20  ;;  %v1933_v22 = vld [vmem:[%s2733_s11 + $0x28] sm:$0xff]  ;;  %v1932_v19 = vld [vmem:[%s2733_s11 + $0x20] sm:$0xff] }
 0x550   :  { %1769 = vmatmul.msk.bf16.vlgmr.msrb.gmra.mxu0 %vm112_vm0, %v622_v23  ;;  %v1931_v23 = vld [vmem:[%s2733_s11 + $0x18] sm:$0xff] }
 0x552   :  { %822 = vmatpush.bf16.msra.mxu2 %v1934_v21 }
 0x556   :  { %823 = vmatpush.bf16.msra.mxu2 %v1933_v22 }
 0x55a   :  { %824 = vmatpush.bf16.msra.mxu2 %v1932_v19 }
 0x55e   :  { %825 = vmatpush.bf16.msra.mxu2 %v1931_v23 }
 0x5cd   :  { %v650_v25 = vpop.f32.mrf.mxu0 }
 0x5ce   :  { %v651_v26 = vadd.f32 %v2000_v24, %v650_v25  ;;  %v1929_v25 = vld [vmem:[%s2733_s11 + $0x8] sm:$0xff] }
 0x5d0   :  { %v655_v3 = vadd.f32 %v651_v26, %v2248_v6  ;;  %v1928_v26 = vld [vmem:[%s2733_s11] sm:$0xff] }
 0x5d2   :  { %v657_v27 = vsel %vm112_vm0, %v655_v3, 0.0 }
 0x5d3   :  { %658 = vadd.xlane.f32.xlu0 %v657_v27 }
 0x5d5   :  { %v652_v14 = vpop.f32.mrf.mxu0 }
 0x5d6   :  { %v653_v28 = vadd.f32 %v2000_v24, %v652_v14  ;;  %v1930_v24 = vld [vmem:[%s2733_s11 + $0x10] sm:$0xff] }
 0x5d7   :  { %826 = vmatpush.bf16.msra.mxu2 %v1930_v24 }
 0x5d8   :  { %v656_v29 = vadd.f32 %v653_v28, %v2250_v7 }
 0x5da   :  { %v660_v30 = vsel %vm112_vm0, %v656_v29, 0.0 }
 0x5db   :  { %661 = vadd.xlane.f32.xlu2 %v660_v30  ;;  %827 = vmatpush.bf16.msra.mxu2 %v1929_v25 }
 0x5df   :  { %828 = vmatpush.bf16.msra.mxu2 %v1928_v26 }
 0x646   :  { %v659_v6 = vpop.xlane.xlu0 %658 }
 0x647   :  { %v670_v39 = vmul.f32 %v2414_v37, %v659_v6 }
 0x649   :  { %v672_v40 = vsub.f32 %v655_v3, %v670_v39  ;;  %v2003_v3 = vld [vmem:[%s2732_s10] ss:$0 sm:$0xff] }
 0x64b   :  { %v674_v41 = vmul.f32 %v672_v40, %v672_v40 }
 0x64d   :  { %v676_v7 = vsel %vm112_vm0, %v674_v41, 0.0 }
 0x64e   :  { %v662_v42 = vpop.xlane.xlu2 %661  ;;  %677 = vadd.xlane.f32.xlu1 %v676_v7 }
 0x64f   :  { %v671_v43 = vmul.f32 %v2414_v37, %v662_v42 }
 0x651   :  { %v673_v45 = vsub.f32 %v656_v29, %v671_v43 }
 0x653   :  { %v675_v46 = vmul.f32 %v673_v45, %v673_v45 }
 0x655   :  { %v679_v47 = vsel %vm112_vm0, %v675_v46, 0.0 }
 0x656   :  { %680 = vadd.xlane.f32.xlu2 %v679_v47 }
 0x6c1   :  { %v678_v49 = vpop.xlane.xlu1 %677 }
 0x6c2   :  { %v682_v50 = vmul.f32 %v678_v49, %v2414_v37 }
 0x6c4   :  { %v684_v52 = vadd.f32 1e-05, %v682_v50  ;;  %v2004_v50 = vld [vmem:[%s2734_s12] ss:$0 sm:$0xff] }
 0x6c6   :  { %2049 = vrsqrt.f32 %v684_v52  ;;  %vm692_vm7 = vweird.f32 %v684_v52 }
 0x6c9   :  { %v681_v53 = vpop.xlane.xlu2 %680 }
 0x6ca   :  { %v683_v54 = vmul.f32 %v681_v53, %v2414_v37 }
 0x6cc   :  { %v2050_v55 = vpop.eup %2049  ;;  %v685_v56 = vadd.f32 1e-05, %v683_v54 }
 0x6cd   :  { %v687_v57 = vmul.f32 %v2050_v55, %v684_v52  ;;  %vm693_vm6 = vweird.f32 %v2050_v55 }
 0x6ce   :  { %2051 = vrsqrt.f32 %v685_v56  ;;  %vm694_vm8 = vmor %vm692_vm7, %vm693_vm6  ;;  %vm702_vm10 = vweird.f32 %v685_v56 }
 0x6cf   :  { %v688_v58 = vmul.f32 %v2050_v55, %v687_v57 }
 0x6d1   :  { %v689_v59 = vmul.f32 0.5, %v688_v58 }
 0x6d3   :  { %v690_v60 = vsub.f32 1.5, %v689_v59 }
 0x6d4   :  { %v2052_v61 = vpop.eup %2051 }
 0x6d5   :  { %v691_v62 = vmul.f32 %v2050_v55, %v690_v60  ;;  %v697_v63 = vmul.f32 %v2052_v61, %v685_v56  ;;  %vm703_vm9 = vweird.f32 %v2052_v61 }
 0x6d6   :  { %vm704_vm11 = vmor %vm702_vm10, %vm703_vm9 }
 0x6d7   :  { %v698_v0 = vmul.f32 %v2052_v61, %v697_v63  ;;  %v695_v1 = vsel %vm694_vm8, %v2050_v55, %v691_v62 }
 0x6d8   :  { %v706_v8 = vmul.f32 %v695_v1, %v672_v40 }
 0x6d9   :  { %v699_v2 = vmul.f32 0.5, %v698_v0 }
 0x6da   :  { %v711_v12 = vmul.f32 %v2001_v5, %v706_v8  ;;  %v1937_v8 = vld [vmem:[%s2725_s3 + $0x18] sm:$0xff] }
 0x6db   :  { %v700_v4 = vsub.f32 1.5, %v699_v2  ;;  %964 = vmatpush.bf16.msra.mxu3 %v1937_v8 }
 0x6dc   :  { %v716_v16 = vadd.f32 %v2002_v11, %v711_v12 }
 0x6dd   :  { %v701_v9 = vmul.f32 %v2052_v61, %v700_v4 }
 0x6df   :  { %v705_v10 = vsel %vm704_vm11, %v2052_v61, %v701_v9 }
 0x6e0   :  { %v707_v13 = vmul.f32 %v705_v10, %v673_v45 }
 0x6e2   :  { %v712_v15 = vmul.f32 %v2001_v5, %v707_v13 }
 0x6e4   :  { %v717_v17 = vadd.f32 %v2002_v11, %v712_v15  ;;  %v1936_v11 = vld [vmem:[%s2725_s3 + $0x10] sm:$0xff] }
 0x6e5   :  { %965 = vmatpush.bf16.msra.mxu3 %v1936_v11 }
 0x6e6   :  { %v718_v18 = vpack.c.bf16 %v717_v17, %v716_v16 }
 0x6e8   :  { %1778 = vmatmul.msk.bf16.vlgmr.msra.gmra.mxu1 %vm112_vm0, %v718_v18 }
 0x765   :  { %v746_v27 = vpop.f32.mrf.mxu1 }
 0x766   :  { %v747_v14 = vadd.f32 %v2003_v3, %v746_v27 }
 0x768   :  { %v753_v28 = vmul.f32 0.044715, %v747_v14  ;;  %v751_v43 = vmul.f32 0.5, %v747_v14 }
 0x76a   :  { %v755_v29 = vmul.f32 %v753_v28, %v747_v14 }
 0x76c   :  { %v757_v30 = vmul.f32 %v755_v29, %v747_v14 }
 0x76d   :  { %v748_v31 = vpop.f32.mrf.mxu1 }
 0x76e   :  { %v759_v32 = vadd.f32 %v757_v30, %v747_v14  ;;  %v749_v33 = vadd.f32 %v2003_v3, %v748_v31  ;;  %v2005_v14 = vld [vmem:[%s2735_s13] ss:$0 sm:$0xff] }
 0x76f   :  { %v2006_v31 = vld [vmem:[%s2736_s14] ss:$0 sm:$0xff] }
 0x770   :  { %v754_v34 = vmul.f32 0.044715, %v749_v33  ;;  %v761_v35 = vmul.f32 0.7978846, %v759_v32  ;;  %v752_v45 = vmul.f32 0.5, %v749_v33 }
 0x772   :  { %v756_v36 = vmul.f32 %v754_v34, %v749_v33  ;;  %2053 = vtanh.f32 %v761_v35 }
 0x774   :  { %v758_v6 = vmul.f32 %v756_v36, %v749_v33 }
 0x776   :  { %v760_v39 = vadd.f32 %v758_v6, %v749_v33 }
 0x778   :  { %v762_v40 = vmul.f32 0.7978846, %v760_v39  ;;  %v2054_v41 = vpop.eup %2053  ;;  %v2007_v39 = vld [vmem:[%s2726_s4 + $0x1] ss:$0 sm:$0xff]  ;;  %s2750_s4 = smov 64  }
 0x779   :  { %v765_v7 = vadd.f32 1.0, %v2054_v41 }
 0x77a   :  { %2055 = vtanh.f32 %v762_v40 }
 0x77b   :  { %v767_v47 = vmul.f32 %v765_v7, %v751_v43 }
 0x780   :  { %v2056_v42 = vpop.eup %2055 }
 0x781   :  { %v766_v46 = vadd.f32 1.0, %v2056_v42 }
 0x783   :  { %v768_v48 = vmul.f32 %v766_v46, %v752_v45 }
 0x785   :  { %v769_v49 = vpack.c.bf16 %v768_v48, %v767_v47 }
 0x787   :  { %829 = vmatmul.bf16.vlgmr.msra.gmra.mxu2 %v769_v49 }
 0x80a   :  { %v830_v51 = vpop.f32.mrf.mxu2 }
 0x80b   :  { %v831_v52 = vadd.f32 %v2004_v50, %v830_v51 }
 0x80d   :  { %v835_v53 = vadd.f32 %v831_v52, %v716_v16 }
 0x80f   :  { %v837_v54 = vsel %vm112_vm0, %v835_v53, 0.0 }
 0x810   :  { %838 = vadd.xlane.f32.xlu0 %v837_v54 }
 0x812   :  { %v832_v55 = vpop.f32.mrf.mxu2 }
 0x813   :  { %v833_v56 = vadd.f32 %v2004_v50, %v832_v55 }
 0x815   :  { %v836_v57 = vadd.f32 %v833_v56, %v717_v17 }
 0x817   :  { %v840_v58 = vsel %vm112_vm0, %v836_v57, 0.0 }
 0x818   :  { %841 = vadd.xlane.f32.xlu2 %v840_v58 }
 0x883   :  { %v839_v59 = vpop.xlane.xlu0 %838 }
 0x884   :  { %v843_v60 = vmul.f32 %v839_v59, %v2414_v37 }
 0x886   :  { %v845_v61 = vsub.f32 %v835_v53, %v843_v60 }
 0x888   :  { %v847_v62 = vmul.f32 %v845_v61, %v845_v61 }
 0x88a   :  { %v849_v63 = vsel %vm112_vm0, %v847_v62, 0.0 }
 0x88b   :  { %v842_v0 = vpop.xlane.xlu2 %841  ;;  %850 = vadd.xlane.f32.xlu0 %v849_v63 }
 0x88c   :  { %v844_v1 = vmul.f32 %v842_v0, %v2414_v37 }
 0x88e   :  { %v846_v2 = vsub.f32 %v836_v57, %v844_v1 }
 0x890   :  { %v848_v4 = vmul.f32 %v846_v2, %v846_v2 }
 0x892   :  { %v852_v5 = vsel %vm112_vm0, %v848_v4, 0.0 }
 0x893   :  { %853 = vadd.xlane.f32.xlu1 %v852_v5 }
 0x8fe   :  { %v851_v9 = vpop.xlane.xlu0 %850 }
 0x8ff   :  { %v855_v10 = vmul.f32 %v851_v9, %v2414_v37 }
 0x901   :  { %v857_v12 = vadd.f32 1e-05, %v855_v10 }
 0x903   :  { %2057 = vrsqrt.f32 %v857_v12  ;;  %vm865_vm13 = vweird.f32 %v857_v12 }
 0x906   :  { %v854_v13 = vpop.xlane.xlu1 %853 }
 0x907   :  { %v856_v15 = vmul.f32 %v854_v13, %v2414_v37 }
 0x909   :  { %v2058_v16 = vpop.eup %2057  ;;  %v858_v17 = vadd.f32 1e-05, %v856_v15 }
 0x90a   :  { %v860_v18 = vmul.f32 %v2058_v16, %v857_v12  ;;  %vm866_vm12 = vweird.f32 %v2058_v16 }
 0x90b   :  { %2059 = vrsqrt.f32 %v858_v17  ;;  %vm867_vm14 = vmor %vm865_vm13, %vm866_vm12  ;;  %vm875_vm5 = vweird.f32 %v858_v17 }
 0x90c   :  { %v861_v20 = vmul.f32 %v2058_v16, %v860_v18 }
 0x90e   :  { %v862_v21 = vmul.f32 0.5, %v861_v20 }
 0x910   :  { %v863_v22 = vsub.f32 1.5, %v862_v21 }
 0x911   :  { %v2060_v19 = vpop.eup %2059 }
 0x912   :  { %v864_v23 = vmul.f32 %v2058_v16, %v863_v22  ;;  %v870_v24 = vmul.f32 %v2060_v19, %v858_v17  ;;  %vm876_vm15 = vweird.f32 %v2060_v19 }
 0x913   :  { %vm877_vm6 = vmor %vm875_vm5, %vm876_vm15 }
 0x914   :  { %v871_v25 = vmul.f32 %v2060_v19, %v870_v24  ;;  %v868_v26 = vsel %vm867_vm14, %v2058_v16, %v864_v23 }
 0x915   :  { %v879_v28 = vmul.f32 %v868_v26, %v845_v61 }
 0x916   :  { %v872_v3 = vmul.f32 0.5, %v871_v25 }
 0x917   :  { %v884_v32 = vmul.f32 %v2005_v14, %v879_v28 }
 0x918   :  { %v873_v27 = vsub.f32 1.5, %v872_v3 }
 0x919   :  { %v2485_v35 = vadd.f32 %v2006_v31, %v884_v32 }
 0x91a   :  { %v874_v29 = vmul.f32 %v2060_v19, %v873_v27 }
 0x91c   :  { %v878_v30 = vsel %vm877_vm6, %v2060_v19, %v874_v29 }
 0x91d   :  { %v880_v33 = vmul.f32 %v878_v30, %v846_v2 }
 0x91f   :  { %v885_v34 = vmul.f32 %v2005_v14, %v880_v33 }
 0x921   :  { %v2487_v36 = vadd.f32 %v2006_v31, %v885_v34  ;;  %v2105_v31 = vld [vmem:[%s2724_s2] ss:$0 sm:$0xff] }
 0x923   :  { %v939_v6 = vpack.c.bf16 %v2487_v36, %v2485_v35 }
 0x925   :  { %1855 = vmatmul.msk.bf16.vlgmr.msra.gmra.mxu3 %vm112_vm0, %v939_v6 }
 0x9a8   :  { %v967_v40 = vpop.f32.mrf.mxu3 }
 0x9a9   :  { %v968_v41 = vadd.f32 %v2007_v39, %v967_v40 }
 0x9ab   :  { %v972_v7 = vpack.c.bf16 %v968_v41, %v968_v41 }
 0x9ad   :  { %v975_v42 = vunpack.c.l.b16 %v972_v7 }
 0x9af   :  { %v2495_v43 = vpack.c.b16 %v975_v42, %v975_v42 }
 0x9b0   :  { %v969_v45 = vpop.f32.mrf.mxu3 }
 0x9b1   :  { %v970_v46 = vadd.f32 %v2007_v39, %v969_v45  ;;  %1090 = vrot.lane.b32.xlu1 %v2495_v43, %s2135_s17  ;;  %977 = vrot.lane.b32.xlu2 %v2495_v43, %s2134_s16 }
 0x9b3   :  { %v973_v47 = vpack.c.bf16 %v970_v46, %v970_v46 }
 0x9b5   :  { %v999_v48 = vunpack.c.l.b16 %v973_v47 }
 0x9b7   :  { %v2501_v49 = vpack.c.b16 %v999_v48, %v999_v48 }
 0x9b9   :  { %1001 = vrot.lane.b32.xlu0 %v2501_v49, %s2134_s16  ;;  %1225 = vrot.lane.b32.xlu1 %v2501_v49, %s2137_s19 }
 0x9ba   :  { %1088 = vrot.lane.b32.xlu2 %v2495_v43, %s2136_s18 }
 0x9c1   :  { %1113 = vrot.lane.b32.xlu0 %v2501_v49, %s2135_s17  ;;  %1314 = vrot.lane.b32.xlu1 %v2495_v43, %s2138_s20  ;;  %s1724_s17 = sshll.u32 %s2737_s15, 4  ;;  %s1725_s17 = int_to_ptr.hbm [resolvable:$true] %s1724_s17 }
 0x9c2   :  { %1202 = vrot.lane.b32.xlu2 %v2495_v43, %s2137_s19 }
 0x9c9   :  { %1111 = vrot.lane.b32.xlu0 %v2501_v49, %s2136_s18  ;;  %1335 = vrot.lane.b32.xlu1 %v2501_v49, %s2139_s21  ;;  %s2751_s18 = smov 56  }
 0x9ca   :  { %1223 = vrot.lane.b32.xlu2 %v2501_v49, %s2140_s26 }
 0x9d1   :  { %1200 = vrot.lane.b32.xlu0 %v2495_v43, %s2140_s26  ;;  %s2754_s26 = smov 8  }
 0x9d2   :  { %1312 = vrot.lane.b32.xlu2 %v2495_v43, %s2139_s21  ;;  %s2753_s21 = smov 40  }
 0x9d9   :  { %1337 = vrot.lane.b32.xlu0 %v2501_v49, %s2138_s20 }
 0x9da   :  { %1046 = vrot.lane.b32.xlu2 %v2495_v43, %s2750_s4 }
 0xa0b   :  { %v978_v50 = vpop.permute.xlu2 %977 }
 0xa0c   :  { %v983_v51 = vsel %vm143_vm2, %v978_v50, 0 }
 0xa0d   :  { %992 = vmatpush.bf16.xpose.msra.mxu0 %v983_v51 }
 0xa14   :  { %v1089_v52 = vpop.permute.xlu2 %1088  ;;  %1856 = vmatmul.msk.bf16.vlgmr.msra.gmra.mxu0 %vm143_vm2, %v972_v7 }
 0xa1c   :  { %v1203_v53 = vpop.permute.xlu2 %1202 }
 0xa1d   :  { %v1208_v62 = vsel %vm143_vm2, %v1203_v53, 0 }
 0xa23   :  { %v1091_v55 = vpop.permute.xlu1 %1090 }
 0xa24   :  { %v1224_v54 = vpop.permute.xlu2 %1223  ;;  %v1096_v59 = vsel %vm143_vm2, %v1091_v55, 0 }
 0xa2b   :  { %v1002_v56 = vpop.permute.xlu0 %1001  ;;  %v1226_v60 = vpop.permute.xlu1 %1225 }
 0xa2c   :  { %v1007_v57 = vsel %vm143_vm2, %v1002_v56, 0  ;;  %v1313_v58 = vpop.permute.xlu2 %1312  ;;  %v1231_v1 = vsel %vm143_vm2, %v1226_v60, 0 }
 0xa2d   :  { %1016 = vmatpush.bf16.xpose.msrb.mxu1 %v1007_v57 }
 0xa33   :  { %v1114_v61 = vpop.permute.xlu0 %1113  ;;  %v1315_v5 = vpop.permute.xlu1 %1314 }
 0xa34   :  { %v1119_v63 = vsel %vm143_vm2, %v1114_v61, 0  ;;  %v1047_v0 = vpop.permute.xlu2 %1046  ;;  %1857 = vmatmul.msk.bf16.vlgmr.msrb.gmra.mxu1 %vm143_vm2, %v973_v47  ;;  %v1320_v9 = vsel %vm143_vm2, %v1315_v5, 0 }
 0xa35   :  { %1105 = vmatpush.bf16.xpose.msra.mxu1 %v1096_v59  ;;  %v1052_v2 = vsel %vm216_vm1, %v1047_v0, 0  ;;  %1128 = vmatpush.bf16.xpose.msrb.mxu2 %v1119_v63 }
 0xa36   :  { %1061 = vmatpush.bf16.msrb.mxu3 %v1052_v2 }
 0xa3b   :  { %v1112_v4 = vpop.permute.xlu0 %1111  ;;  %v1336_v12 = vpop.permute.xlu1 %1335 }
 0xa3c   :  { %1861 = vmatmul.msk.bf16.vlgmr.msrb.gmra.mxu2 %vm143_vm2, %v1112_v4 }
 0xa3d   :  { %1217 = vmatpush.bf16.xpose.msrb.mxu1 %v1208_v62  ;;  %1240 = vmatpush.bf16.xpose.msra.mxu2 %v1231_v1 }
 0xa43   :  { %v1201_v8 = vpop.permute.xlu0 %1200 }
 0xa44   :  { %1860 = vmatmul.msk.bf16.vlgmr.msra.gmra.mxu1 %vm143_vm2, %v1089_v52 }
 0xa45   :  { %1329 = vmatpush.bf16.xpose.msra.mxu1 %v1320_v9 }
 0xa4b   :  { %v1338_v10 = vpop.permute.xlu0 %1337 }
 0xa4c   :  { %v1343_v11 = vsel %vm143_vm2, %v1338_v10, 0  ;;  %1865 = vmatmul.msk.bf16.vlgmr.msra.gmra.mxu2 %vm143_vm2, %v1224_v54 }
 0xa4d   :  { %1352 = vmatpush.bf16.xpose.msrb.mxu2 %v1343_v11 }
 0xa54   :  { %1864 = vmatmul.msk.bf16.vlgmr.msrb.gmra.mxu1 %vm143_vm2, %v1201_v8 }
 0xa5c   :  { %1869 = vmatmul.msk.bf16.vlgmr.msrb.gmra.mxu2 %vm143_vm2, %v1336_v12 }
 0xa64   :  { %1868 = vmatmul.msk.bf16.vlgmr.msra.gmra.mxu1 %vm143_vm2, %v1313_v58 }
 0xa91   :  { %v994_v13 = vpop.f32.mrf.mxu0 }
 0xa92   :  { %v995_v15 = vadd.f32 %v2299_v38, %v994_v13 }
 0xa94   :  { %v1022_v16 = vsel %vm143_vm2, %v995_v15, -inf }
 0xa95   :  { %1023 = vmax.xlane.f32.xlu0 %v1022_v16 }
 0xa99   :  { %v996_v17 = vpop.f32.mrf.mxu0 }
 0xab1   :  { %v1018_v18 = vpop.f32.mrf.mxu1 }
 0xab2   :  { %v1019_v20 = vadd.f32 %v2306_v44, %v1018_v18 }
 0xab4   :  { %v1025_v21 = vsel %vm143_vm2, %v1019_v20, -inf }
 0xab5   :  { %1026 = vmax.xlane.f32.xlu2 %v1025_v21 }
 0xab9   :  { %v1020_v22 = vpop.f32.mrf.mxu1 }
 0xabf   :  { %v1130_v19 = vpop.f32.mrf.mxu2 }
 0xac0   :  { %v1131_v23 = vadd.f32 %v2306_v44, %v1130_v19 }
 0xac1   :  { %v1107_v24 = vpop.f32.mrf.mxu1 }
 0xac2   :  { %v1108_v25 = vadd.f32 %v2299_v38, %v1107_v24  ;;  %v1137_v26 = vsel %vm143_vm2, %v1131_v23, -inf }
 0xac3   :  { %1138 = vmax.xlane.f32.xlu0 %v1137_v26 }
 0xac4   :  { %v1134_v3 = vsel %vm143_vm2, %v1108_v25, -inf }
 0xac5   :  { %1135 = vmax.xlane.f32.xlu1 %v1134_v3 }
 0xac7   :  { %v1132_v27 = vpop.f32.mrf.mxu2 }
 0xac9   :  { %v1109_v14 = vpop.f32.mrf.mxu1 }
 0xacf   :  { %v1242_v28 = vpop.f32.mrf.mxu2 }
 0xad0   :  { %v1243_v29 = vadd.f32 %v2306_v44, %v1242_v28  ;;  %v2106_v44 = vld [vmem:[%s2724_s2 + $0x1] ss:$0 sm:$0xff]  ;;  %s2752_s2 = smov 48  }
 0xad1   :  { %v1219_v30 = vpop.f32.mrf.mxu1 }
 0xad2   :  { %v1220_v32 = vadd.f32 %v2105_v31, %v1219_v30  ;;  %v1249_v33 = vsel %vm143_vm2, %v1243_v29, -inf }
 0xad3   :  { %1250 = vmax.xlane.f32.xlu1 %v1249_v33 }
 0xad4   :  { %v1246_v38 = vsel %vm143_vm2, %v1220_v32, -inf }
 0xad5   :  { %1247 = vmax.xlane.f32.xlu2 %v1246_v38 }
 0xad7   :  { %1158 = vrot.lane.b32.xlu0 %v2495_v43, %s2751_s18  ;;  %v1244_v34 = vpop.f32.mrf.mxu2 }
 0xad9   :  { %v1221_v6 = vpop.f32.mrf.mxu1 }
 0xadf   :  { %v1354_v39 = vpop.f32.mrf.mxu2 }
 0xae0   :  { %v1355_v40 = vadd.f32 %v2106_v44, %v1354_v39 }
 0xae1   :  { %v1331_v41 = vpop.f32.mrf.mxu1 }
 0xae2   :  { %v1361_v7 = vsel %vm143_vm2, %v1355_v40, -inf  ;;  %v2566_v46 = vadd.f32 %v2105_v31, %v1331_v41 }
 0xae3   :  { %1362 = vmax.xlane.f32.xlu1 %v1361_v7 }
 0xae4   :  { %v1358_v47 = vsel %vm143_vm2, %v2566_v46, -inf }
 0xae7   :  { %v1356_v42 = vpop.f32.mrf.mxu2 }
 0xae9   :  { %v1333_v45 = vpop.f32.mrf.mxu1 }
 0xafc   :  { %1067 = vrot.lane.b32.xlu1 %v2501_v49, %s2750_s4 }
 0xb01   :  { %1359 = vmax.xlane.f32.xlu0 %v1358_v47 }
 0xb08   :  { %v1024_v48 = vpop.xlane.xlu0 %1023 }
 0xb09   :  { %v1028_v50 = vsub.f32 %v995_v15, %v1024_v48 }
 0xb0b   :  { %v1030_v51 = vmul.f32 1.442695, %v1028_v50 }
 0xb0d   :  { %2061 = vpow2.f32 %v1030_v51 }
 0xb13   :  { %v2572_v52 = vpop.eup %2061 }
 0xb14   :  { %v1034_v53 = vsel %vm143_vm2, %v2572_v52, 0.0 }
 0xb15   :  { %1035 = vadd.xlane.f32.xlu2 %v1034_v53  ;;  %1270 = vrot.lane.b32.xlu0 %v2495_v43, %s2752_s2 }
 0xb28   :  { %v1027_v54 = vpop.xlane.xlu2 %1026 }
 0xb29   :  { %v1029_v55 = vsub.f32 %v1019_v20, %v1027_v54 }
 0xb2b   :  { %v1032_v56 = vmul.f32 1.442695, %v1029_v55 }
 0xb2d   :  { %1179 = vrot.lane.b32.xlu2 %v2501_v49, %s2751_s18  ;;  %2063 = vpow2.f32 %v1032_v56 }
 0xb33   :  { %v2580_v61 = vpop.eup %2063 }
 0xb34   :  { %v1037_v63 = vsel %vm143_vm2, %v2580_v61, 0.0 }
 0xb36   :  { %v1139_v57 = vpop.xlane.xlu0 %1138 }
 0xb37   :  { %v1141_v58 = vsub.f32 %v1131_v23, %v1139_v57 }
 0xb38   :  { %v1136_v60 = vpop.xlane.xlu1 %1135 }
 0xb39   :  { %v1144_v59 = vmul.f32 1.442695, %v1141_v58  ;;  %v1140_v62 = vsub.f32 %v1108_v25, %v1136_v60 }
 0xb3b   :  { %2065 = vpow2.f32 %v1144_v59  ;;  %v1142_v0 = vmul.f32 1.442695, %v1140_v62 }
 0xb3d   :  { %2067 = vpow2.f32 %v1142_v0 }
 0xb3f   :  { %1038 = vadd.xlane.f32.xlu0 %v1037_v63 }
 0xb41   :  { %v2584_v1 = vpop.eup %2065 }
 0xb42   :  { %v1149_v4 = vsel %vm143_vm2, %v2584_v1, 0.0 }
 0xb43   :  { %v2068_v13 = vpop.eup %2067 }
 0xb44   :  { %v1146_v16 = vsel %vm143_vm2, %v2068_v13, 0.0 }
 0xb46   :  { %v1251_v2 = vpop.xlane.xlu1 %1250 }
 0xb47   :  { %v1253_v5 = vsub.f32 %v1243_v29, %v1251_v2  ;;  %1150 = vadd.xlane.f32.xlu0 %v1149_v4 }
 0xb48   :  { %v1248_v8 = vpop.xlane.xlu2 %1247 }
 0xb49   :  { %v1256_v9 = vmul.f32 1.442695, %v1253_v5  ;;  %v1252_v10 = vsub.f32 %v1220_v32, %v1248_v8  ;;  %v1159_v11 = vpop.permute.xlu0 %1158 }
 0xb4a   :  { %v1164_v12 = vsel %vm216_vm1, %v1159_v11, 0 }
 0xb4b   :  { %v1254_v15 = vmul.f32 1.442695, %v1252_v10  ;;  %1173 = vmatpush.bf16.msra.mxu3 %v1164_v12  ;;  %2069 = vpow2.f32 %v1256_v9 }
 0xb4d   :  { %2071 = vpow2.f32 %v1254_v15 }
 0xb4f   :  { %1147 = vadd.xlane.f32.xlu0 %v1146_v16 }
 0xb51   :  { %v2590_v17 = vpop.eup %2069 }
 0xb52   :  { %v1261_v21 = vsel %vm143_vm2, %v2590_v17, 0.0 }
 0xb53   :  { %v2592_v18 = vpop.eup %2071 }
 0xb54   :  { %v1258_v20 = vsel %vm143_vm2, %v2592_v18, 0.0 }
 0xb55   :  { %1259 = vadd.xlane.f32.xlu1 %v1258_v20 }
 0xb56   :  { %1262 = vadd.xlane.f32.xlu2 %v1261_v21  ;;  %v1363_v22 = vpop.xlane.xlu1 %1362 }
 0xb57   :  { %v1365_v19 = vsub.f32 %v1355_v40, %v1363_v22 }
 0xb59   :  { %v1368_v23 = vmul.f32 1.442695, %v1365_v19 }
 0xb5b   :  { %2073 = vpow2.f32 %v1368_v23 }
 0xb61   :  { %v2598_v24 = vpop.eup %2073 }
 0xb62   :  { %v1373_v25 = vsel %vm143_vm2, %v2598_v24, 0.0 }
 0xb63   :  { %1291 = vrot.lane.b32.xlu0 %v2501_v49, %s2752_s2  ;;  %1374 = vadd.xlane.f32.xlu1 %v1373_v25 }
 0xb6e   :  { %1382 = vrot.lane.b32.xlu2 %v2495_v43, %s2753_s21  ;;  %v1068_v26 = vpop.permute.xlu1 %1067 }
 0xb6f   :  { %v1073_v3 = vsel %vm216_vm1, %v1068_v26, 0 }
 0xb70   :  { %1082 = vmatpush.bf16.msrb.mxu0 %v1073_v3 }
 0xb74   :  { %v1360_v27 = vpop.xlane.xlu0 %1359 }
 0xb75   :  { %v1364_v14 = vsub.f32 %v2566_v46, %v1360_v27 }
 0xb77   :  { %v1366_v28 = vmul.f32 1.442695, %v1364_v14 }
 0xb79   :  { %2075 = vpow2.f32 %v1366_v28 }
 0xb7c   :  { %1403 = vrot.lane.b32.xlu1 %v2501_v49, %s2753_s21 }
 0xb7f   :  { %v2076_v30 = vpop.eup %2075 }
 0xb80   :  { %v1370_v31 = vsel %vm143_vm2, %v2076_v30, 0.0 }
 0xb87   :  { %v1271_v38 = vpop.permute.xlu0 %1270 }
 0xb88   :  { %v1036_v29 = vpop.xlane.xlu2 %1035  ;;  %v1276_v39 = vsel %vm216_vm1, %v1271_v38, 0 }
 0xb89   :  { %2077 = vrcp.f32 %v1036_v29 }
 0xb8d   :  { %1371 = vadd.xlane.f32.xlu0 %v1370_v31  ;;  %v1939_v31 = vld [vmem:[%s2727_s5 + $0x18] sm:$0xff] }
 0xb8e   :  { %1479 = vmatpush.bf16.msrb.mxu1 %v1939_v31 }
 0xb8f   :  { %v2078_v32 = vpop.eup %2077 }
 0xb90   :  { %v1042_v43 = vmul.f32 %v2078_v32, %v2572_v52  ;;  %v1180_v33 = vpop.permute.xlu2 %1179  ;;  %v1938_v32 = vld [vmem:[%s2727_s5 + $0x10] sm:$0xff] }
 0xb91   :  { %v1185_v34 = vsel %vm216_vm1, %v1180_v33, 0 }
 0xb92   :  { %v1044_v6 = vpack.c.bf16 %v1042_v43, %v1042_v43  ;;  %1194 = vmatpush.bf16.msra.mxu0 %v1185_v34  ;;  %1480 = vmatpush.bf16.msrb.mxu1 %v1938_v32 }
 0xb94   :  { %1858 = vmatmul.msk.bf16.vlgmr.msrb.gmra.mxu3 %vm143_vm2, %v1044_v6 }
 0xb95   :  { %1285 = vmatpush.bf16.msrb.mxu3 %v1276_v39 }
 0xbb2   :  { %v1039_v49 = vpop.xlane.xlu0 %1038 }
 0xbb3   :  { %2079 = vrcp.f32 %v1039_v49 }
 0xbb9   :  { %v2080_v44 = vpop.eup %2079 }
 0xbba   :  { %v1043_v40 = vmul.f32 %v2080_v44, %v2580_v61  ;;  %v1151_v41 = vpop.xlane.xlu0 %1150 }
 0xbbb   :  { %2081 = vrcp.f32 %v1151_v41 }
 0xbbc   :  { %v1045_v7 = vpack.c.bf16 %v1043_v40, %v1043_v40 }
 0xbbe   :  { %1859 = vmatmul.msk.bf16.vlgmr.msrb.gmra.mxu0 %vm143_vm2, %v1045_v7 }
 0xbc1   :  { %v2082_v45 = vpop.eup %2081 }
 0xbc2   :  { %v1148_v42 = vpop.xlane.xlu0 %1147  ;;  %v1155_v46 = vmul.f32 %v2082_v45, %v2584_v1 }
 0xbc3   :  { %2083 = vrcp.f32 %v1148_v42 }
 0xbc4   :  { %v1157_v52 = vpack.c.bf16 %v1155_v46, %v1155_v46 }
 0xbc8   :  { %v1260_v51 = vpop.xlane.xlu1 %1259 }
 0xbc9   :  { %v2084_v47 = vpop.eup %2083  ;;  %v1263_v48 = vpop.xlane.xlu2 %1262  ;;  %2085 = vrcp.f32 %v1260_v51 }
 0xbca   :  { %v1154_v50 = vmul.f32 %v2084_v47, %v2068_v13  ;;  %2087 = vrcp.f32 %v1263_v48 }
 0xbcc   :  { %v1156_v53 = vpack.c.bf16 %v1154_v50, %v1154_v50  ;;  %v2008_v50 = vld [vmem:[%s2728_s6 + $0x1] ss:$0 sm:$0xff] }
 0xbce   :  { %1862 = vmatmul.msk.bf16.vlgmr.msra.gmra.mxu3 %vm143_vm2, %v1156_v53  ;;  %1863 = vmatmul.msk.bf16.vlgmr.msra.gmra.mxu0 %vm143_vm2, %v1157_v52 }
 0xbcf   :  { %v2086_v56 = vpop.eup %2085 }
 0xbd0   :  { %v2088_v57 = vpop.eup %2087  ;;  %v1266_v60 = vmul.f32 %v2086_v56, %v2592_v18 }
 0xbd1   :  { %v1383_v54 = vpop.permute.xlu2 %1382  ;;  %v1267_v61 = vmul.f32 %v2088_v57, %v2590_v17 }
 0xbd2   :  { %v1388_v55 = vsel %vm216_vm1, %v1383_v54, 0  ;;  %v1268_v62 = vpack.c.bf16 %v1266_v60, %v1266_v60 }
 0xbd3   :  { %1397 = vmatpush.bf16.msra.mxu3 %v1388_v55  ;;  %v1269_v63 = vpack.c.bf16 %v1267_v61, %v1267_v61 }
 0xbd5   :  { %v1292_v58 = vpop.permute.xlu0 %1291 }
 0xbd6   :  { %v1297_v59 = vsel %vm216_vm1, %v1292_v58, 0  ;;  %v1375_v0 = vpop.xlane.xlu1 %1374 }
 0xbd7   :  { %1306 = vmatpush.bf16.msrb.mxu0 %v1297_v59  ;;  %2089 = vrcp.f32 %v1375_v0 }
 0xbdd   :  { %v2090_v1 = vpop.eup %2089 }
 0xbde   :  { %1866 = vmatmul.msk.bf16.vlgmr.msrb.gmra.mxu3 %vm143_vm2, %v1268_v62  ;;  %1867 = vmatmul.msk.bf16.vlgmr.msrb.gmra.mxu0 %vm143_vm2, %v1269_v63  ;;  %v1379_v2 = vmul.f32 %v2090_v1, %v2598_v24 }
 0xbe0   :  { %v1381_v8 = vpack.c.bf16 %v1379_v2, %v1379_v2 }
 0xbee   :  { %v1404_v4 = vpop.permute.xlu1 %1403 }
 0xbef   :  { %v1409_v5 = vsel %vm216_vm1, %v1404_v4, 0 }
 0xbf0   :  { %1418 = vmatpush.bf16.msra.mxu0 %v1409_v5 }
 0xbf3   :  { %1871 = vmatmul.msk.bf16.vlgmr.msra.gmra.mxu0 %vm143_vm2, %v1381_v8 }
 0xc00   :  { %v1372_v9 = vpop.xlane.xlu0 %1371 }
 0xc01   :  { %2091 = vrcp.f32 %v1372_v9 }
 0xc07   :  { %v2092_v10 = vpop.eup %2091 }
 0xc08   :  { %v1378_v11 = vmul.f32 %v2092_v10, %v2076_v30  ;;  %v1940_v10 = vld [vmem:[%s2731_s9 + $0x10] sm:$0xff] }
 0xc0a   :  { %v1380_v12 = vpack.c.bf16 %v1378_v11, %v1378_v11 }
 0xc0c   :  { %1870 = vmatmul.msk.bf16.vlgmr.msra.gmra.mxu3 %vm143_vm2, %v1380_v12 }
 0xc17   :  { %v1063_v13 = vpop.f32.mrf.mxu3 }
 0xc1f   :  { %v1065_v15 = vpop.f32.mrf.mxu3 }
 0xc3b   :  { %v1084_v16 = vpop.f32.mrf.mxu0 }
 0xc43   :  { %v1086_v17 = vpop.f32.mrf.mxu0 }
 0xc4b   :  { %v1196_v18 = vpop.f32.mrf.mxu0 }
 0xc51   :  { %v1175_v20 = vpop.f32.mrf.mxu3 }
 0xc52   :  { %v1982_v21 = vpack.i.bf16 %v1196_v18, %v1175_v20 }
 0xc53   :  { %v1198_v22 = vpop.f32.mrf.mxu0 }
 0xc54   :  { %1983 = vrot.lane.b32.xlu2 %v1982_v21, %s2754_s26 }
 0xc59   :  { %v1177_v19 = vpop.f32.mrf.mxu3 }
 0xc5b   :  { %v1308_v23 = vpop.f32.mrf.mxu0 }
 0xc61   :  { %v1287_v24 = vpop.f32.mrf.mxu3 }
 0xc62   :  { %v1987_v25 = vpack.i.bf16 %v1308_v23, %v1287_v24 }
 0xc63   :  { %v1310_v26 = vpop.f32.mrf.mxu0 }
 0xc64   :  { %1988 = vrot.lane.b32.xlu0 %v1987_v25, %s2755_s27 }
 0xc69   :  { %v1289_v3 = vpop.f32.mrf.mxu3 }
 0xc6a   :  { %v2009_v3 = vld [vmem:[%s2729_s7 + $0x1] ss:$0 sm:$0xff] }
 0xc70   :  { %v1420_v27 = vpop.f32.mrf.mxu0 }
 0xc78   :  { %v1422_v14 = vpop.f32.mrf.mxu0 }
 0xc8f   :  { %v1399_v28 = vpop.f32.mrf.mxu3 }
 0xc90   :  { %v1992_v29 = vpack.i.bf16 %v1420_v27, %v1399_v28 }
 0xc92   :  { %1993 = vrot.lane.b32.xlu1 %v1992_v29, %s2756_s22  ;;  %v2010_v29 = vld [vmem:[%s2730_s8 + $0x1] ss:$0 sm:$0xff] }
 0xc97   :  { %v1401_v30 = vpop.f32.mrf.mxu3 }
 0xcae   :  { %v1984_v43 = vpop.permute.xlu2 %1983 }
 0xcaf   :  { %v1986_v38 = vunpack.i.h.bf16 %v1984_v43  ;;  %v1985_v34 = vunpack.i.l.bf16 %v1984_v43 }
 0xcb1   :  { %v1449_v44 = vsel %vm143_vm2, %v1084_v16, %v1986_v38  ;;  %v1448_v40 = vsel %vm143_vm2, %v1063_v13, %v1985_v34  ;;  %v1949_v34 = vld [vmem:[%s2733_s11 + $0x78] sm:$0xff] }
 0xcb2   :  { %1646 = vmatpush.bf16.msrb.mxu3 %v1949_v34 }
 0xcd6   :  { %v1989_v33 = vpop.permute.xlu0 %1988 }
 0xcd7   :  { %v1991_v6 = vunpack.i.h.bf16 %v1989_v33  ;;  %v1990_v39 = vunpack.i.l.bf16 %v1989_v33 }
 0xcd9   :  { %v1450_v42 = vsel %vm616_vm3, %v1448_v40, %v1990_v39  ;;  %v1451_v45 = vsel %vm616_vm3, %v1449_v44, %v1991_v6  ;;  %v1948_v6 = vld [vmem:[%s2733_s11 + $0x70] sm:$0xff]  ;;  %v1947_v39 = vld [vmem:[%s2733_s11 + $0x68] sm:$0xff]  ;;  %v1945_v44 = vld [vmem:[%s2733_s11 + $0x58] sm:$0xff] }
 0xcda   :  { %1647 = vmatpush.bf16.msrb.mxu3 %v1948_v6  ;;  %v1944_v40 = vld [vmem:[%s2733_s11 + $0x50] sm:$0xff] }
 0xcde   :  { %1648 = vmatpush.bf16.msrb.mxu3 %v1947_v39  ;;  %v2013_v39 = vld [vmem:[%s2735_s13 + $0x1] ss:$0 sm:$0xff]  ;;  %s2148_s13 = smov [#allocation2]  }
 0xcdf   :  { %s1722_s1 = sshll.u32 %s2148_s13, 4  ;;  %s1723_s1 = int_to_ptr.vmem [resolvable:$true] %s1722_s1 }
 0xd04   :  { %v1994_v49 = vpop.permute.xlu1 %1993 }
 0xd05   :  { %v1996_v41 = vunpack.i.h.bf16 %v1994_v49  ;;  %v1995_v7 = vunpack.i.l.bf16 %v1994_v49  ;;  %v1946_v49 = vld [vmem:[%s2733_s11 + $0x60] sm:$0xff] }
 0xd06   :  { %1649 = vmatpush.bf16.msrb.mxu3 %v1946_v49 }
 0xd07   :  { %v1452_v46 = vsel %vm619_vm4, %v1450_v42, %v1995_v7  ;;  %v1453_v47 = vsel %vm619_vm4, %v1451_v45, %v1996_v41  ;;  %v1943_v41 = vld [vmem:[%s2733_s11 + $0x48] sm:$0xff]  ;;  %v1942_v7 = vld [vmem:[%s2733_s11 + $0x40] sm:$0xff] }
 0xd08   :  { %v1454_v48 = vpack.c.bf16 %v1453_v47, %v1452_v46  ;;  %v2011_v42 = vld [vmem:[%s2732_s10 + $0x1] ss:$0 sm:$0xff] }
 0xd0a   :  { %1880 = vmatmul.msk.bf16.vlgmr.msrb.gmra.mxu1 %vm112_vm0, %v1454_v48  ;;  %1650 = vmatpush.bf16.msrb.mxu3 %v1945_v44 }
 0xd0e   :  { %1651 = vmatpush.bf16.msrb.mxu3 %v1944_v40  ;;  %v2014_v40 = vld [vmem:[%s2736_s14 + $0x1] ss:$0 sm:$0xff]  ;;  %s2149_s14 = smov 128  }
 0xd12   :  { %1652 = vmatpush.bf16.msrb.mxu3 %v1943_v41 }
 0xd16   :  { %1653 = vmatpush.bf16.msrb.mxu3 %v1942_v7 }
 0xd87   :  { %v1482_v51 = vpop.f32.mrf.mxu1 }
 0xd88   :  { %v1483_v52 = vadd.f32 %v2008_v50, %v1482_v51 }
 0xd8a   :  { %v1487_v53 = vadd.f32 %v1483_v52, %v2485_v35 }
 0xd8c   :  { %v1489_v54 = vsel %vm112_vm0, %v1487_v53, 0.0 }
 0xd8d   :  { %1490 = vadd.xlane.f32.xlu2 %v1489_v54 }
 0xd8f   :  { %v1484_v55 = vpop.f32.mrf.mxu1 }
 0xd90   :  { %v1485_v56 = vadd.f32 %v2008_v50, %v1484_v55 }
 0xd92   :  { %v1488_v57 = vadd.f32 %v1485_v56, %v2487_v36  ;;  %v1941_v36 = vld [vmem:[%s2731_s9 + $0x18] sm:$0xff] }
 0xd93   :  { %1568 = vmatpush.bf16.msra.mxu2 %v1941_v36  ;;  %v2012_v36 = vld [vmem:[%s2734_s12 + $0x1] ss:$0 sm:$0xff] }
 0xd94   :  { %v1492_v58 = vsel %vm112_vm0, %v1488_v57, 0.0 }
 0xd95   :  { %1493 = vadd.xlane.f32.xlu1 %v1492_v58 }
 0xd97   :  { %1569 = vmatpush.bf16.msra.mxu2 %v1940_v10 }
 0xe00   :  { %v1491_v59 = vpop.xlane.xlu2 %1490 }
 0xe01   :  { %v1495_v60 = vmul.f32 %v1491_v59, %v2414_v37 }
 0xe03   :  { %v1497_v61 = vsub.f32 %v1487_v53, %v1495_v60 }
 0xe05   :  { %v1499_v62 = vmul.f32 %v1497_v61, %v1497_v61 }
 0xe07   :  { %v1501_v63 = vsel %vm112_vm0, %v1499_v62, 0.0 }
 0xe08   :  { %v1494_v0 = vpop.xlane.xlu1 %1493  ;;  %1502 = vadd.xlane.f32.xlu0 %v1501_v63 }
 0xe09   :  { %v1496_v35 = vmul.f32 %v1494_v0, %v2414_v37 }
 0xe0b   :  { %v1498_v1 = vsub.f32 %v1488_v57, %v1496_v35 }
 0xe0d   :  { %v1500_v2 = vmul.f32 %v1498_v1, %v1498_v1 }
 0xe0f   :  { %v1504_v4 = vsel %vm112_vm0, %v1500_v2, 0.0 }
 0xe10   :  { %1505 = vadd.xlane.f32.xlu2 %v1504_v4 }
 0xe7b   :  { %v1503_v5 = vpop.xlane.xlu0 %1502 }
 0xe7c   :  { %v1507_v8 = vmul.f32 %v1503_v5, %v2414_v37 }
 0xe7e   :  { %v1509_v9 = vadd.f32 1e-05, %v1507_v8 }
 0xe80   :  { %2093 = vrsqrt.f32 %v1509_v9  ;;  %vm1517_vm2 = vweird.f32 %v1509_v9 }
 0xe83   :  { %v1506_v11 = vpop.xlane.xlu2 %1505 }
 0xe84   :  { %v1508_v12 = vmul.f32 %v1506_v11, %v2414_v37 }
 0xe86   :  { %v2094_v13 = vpop.eup %2093  ;;  %v1510_v15 = vadd.f32 1e-05, %v1508_v12 }
 0xe87   :  { %v1512_v16 = vmul.f32 %v2094_v13, %v1509_v9  ;;  %vm1518_vm1 = vweird.f32 %v2094_v13 }
 0xe88   :  { %2095 = vrsqrt.f32 %v1510_v15  ;;  %vm1519_vm3 = vmor %vm1517_vm2, %vm1518_vm1  ;;  %vm1527_vm7 = vweird.f32 %v1510_v15 }
 0xe89   :  { %v1513_v17 = vmul.f32 %v2094_v13, %v1512_v16 }
 0xe8b   :  { %v1514_v18 = vmul.f32 0.5, %v1513_v17 }
 0xe8d   :  { %v1515_v20 = vsub.f32 1.5, %v1514_v18 }
 0xe8e   :  { %v2096_v21 = vpop.eup %2095 }
 0xe8f   :  { %v1516_v22 = vmul.f32 %v2094_v13, %v1515_v20  ;;  %v1522_v19 = vmul.f32 %v2096_v21, %v1510_v15  ;;  %vm1528_vm4 = vweird.f32 %v2096_v21 }
 0xe90   :  { %vm1529_vm8 = vmor %vm1527_vm7, %vm1528_vm4 }
 0xe91   :  { %v1523_v23 = vmul.f32 %v2096_v21, %v1522_v19  ;;  %v1520_v24 = vsel %vm1519_vm3, %v2094_v13, %v1516_v22 }
 0xe92   :  { %v1531_v27 = vmul.f32 %v1520_v24, %v1497_v61 }
 0xe93   :  { %v1524_v25 = vmul.f32 0.5, %v1523_v23 }
 0xe94   :  { %v1536_v30 = vmul.f32 %v2009_v3, %v1531_v27 }
 0xe95   :  { %v1525_v26 = vsub.f32 1.5, %v1524_v25 }
 0xe96   :  { %v1541_v43 = vadd.f32 %v2010_v29, %v1536_v30 }
 0xe97   :  { %v1526_v14 = vmul.f32 %v2096_v21, %v1525_v26 }
 0xe99   :  { %v1530_v28 = vsel %vm1529_vm8, %v2096_v21, %v1526_v14 }
 0xe9a   :  { %v1532_v31 = vmul.f32 %v1530_v28, %v1498_v1 }
 0xe9c   :  { %v1537_v32 = vmul.f32 %v2009_v3, %v1532_v31 }
 0xe9e   :  { %v1542_v33 = vadd.f32 %v2010_v29, %v1537_v32 }
 0xea0   :  { %v1543_v38 = vpack.c.bf16 %v1542_v33, %v1541_v43 }
 0xea2   :  { %1889 = vmatmul.msk.bf16.vlgmr.msra.gmra.mxu2 %vm112_vm0, %v1543_v38 }
 0xf25   :  { %v1571_v45 = vpop.f32.mrf.mxu2 }
 0xf26   :  { %v1572_v46 = vadd.f32 %v2011_v42, %v1571_v45 }
 0xf28   :  { %v1578_v47 = vmul.f32 0.044715, %v1572_v46  ;;  %v1576_v63 = vmul.f32 0.5, %v1572_v46 }
 0xf2a   :  { %v1580_v48 = vmul.f32 %v1578_v47, %v1572_v46 }
 0xf2c   :  { %v1582_v50 = vmul.f32 %v1580_v48, %v1572_v46 }
 0xf2d   :  { %v1573_v51 = vpop.f32.mrf.mxu2 }
 0xf2e   :  { %v1584_v52 = vadd.f32 %v1582_v50, %v1572_v46  ;;  %v1574_v53 = vadd.f32 %v2011_v42, %v1573_v51 }
 0xf30   :  { %v1579_v54 = vmul.f32 0.044715, %v1574_v53  ;;  %v1586_v55 = vmul.f32 0.7978846, %v1584_v52  ;;  %v1577_v0 = vmul.f32 0.5, %v1574_v53 }
 0xf32   :  { %v1581_v56 = vmul.f32 %v1579_v54, %v1574_v53  ;;  %2097 = vtanh.f32 %v1586_v55 }
 0xf34   :  { %v1583_v57 = vmul.f32 %v1581_v56, %v1574_v53 }
 0xf36   :  { %v1585_v58 = vadd.f32 %v1583_v57, %v1574_v53 }
 0xf38   :  { %v1587_v59 = vmul.f32 0.7978846, %v1585_v58  ;;  %v2098_v60 = vpop.eup %2097 }
 0xf39   :  { %v1590_v61 = vadd.f32 1.0, %v2098_v60 }
 0xf3a   :  { %2099 = vtanh.f32 %v1587_v59 }
 0xf3b   :  { %v1592_v1 = vmul.f32 %v1590_v61, %v1576_v63 }
 0xf40   :  { %v2100_v62 = vpop.eup %2099 }
 0xf41   :  { %v1591_v35 = vadd.f32 1.0, %v2100_v62 }
 0xf43   :  { %v1593_v2 = vmul.f32 %v1591_v35, %v1577_v0 }
 0xf45   :  { %v1594_v4 = vpack.c.bf16 %v1593_v2, %v1592_v1 }
 0xf47   :  { %1654 = vmatmul.bf16.vlgmr.msrb.gmra.mxu3 %v1594_v4 }
 0xfca   :  { %v1655_v5 = vpop.f32.mrf.mxu3 }
 0xfcb   :  { %v1656_v8 = vadd.f32 %v2012_v36, %v1655_v5 }
 0xfcd   :  { %v1660_v9 = vadd.f32 %v1656_v8, %v1541_v43 }
 0xfcf   :  { %v1662_v10 = vsel %vm112_vm0, %v1660_v9, 0.0 }
 0xfd0   :  { %1663 = vadd.xlane.f32.xlu1 %v1662_v10 }
 0xfd2   :  { %v1657_v11 = vpop.f32.mrf.mxu3 }
 0xfd3   :  { %v1658_v12 = vadd.f32 %v2012_v36, %v1657_v11 }
 0xfd5   :  { %v1661_v13 = vadd.f32 %v1658_v12, %v1542_v33 }
 0xfd7   :  { %v1665_v15 = vsel %vm112_vm0, %v1661_v13, 0.0 }
 0xfd8   :  { %1666 = vadd.xlane.f32.xlu2 %v1665_v15 }
0x1043   :  { %v1664_v16 = vpop.xlane.xlu1 %1663 }
0x1044   :  { %v1668_v17 = vmul.f32 %v1664_v16, %v2414_v37 }
0x1046   :  { %v1670_v18 = vsub.f32 %v1660_v9, %v1668_v17 }
0x1048   :  { %v1672_v20 = vmul.f32 %v1670_v18, %v1670_v18 }
0x104a   :  { %v1674_v21 = vsel %vm112_vm0, %v1672_v20, 0.0 }
0x104b   :  { %v1667_v22 = vpop.xlane.xlu2 %1666  ;;  %1675 = vadd.xlane.f32.xlu1 %v1674_v21 }
0x104c   :  { %v1669_v19 = vmul.f32 %v1667_v22, %v2414_v37 }
0x104e   :  { %v1671_v23 = vsub.f32 %v1661_v13, %v1669_v19 }
0x1050   :  { %v1673_v24 = vmul.f32 %v1671_v23, %v1671_v23 }
0x1052   :  { %v1677_v25 = vsel %vm112_vm0, %v1673_v24, 0.0 }
0x1053   :  { %1678 = vadd.xlane.f32.xlu0 %v1677_v25 }
0x10be   :  { %v1676_v26 = vpop.xlane.xlu1 %1675 }
0x10bf   :  { %v1680_v3 = vmul.f32 %v1676_v26, %v2414_v37 }
0x10c1   :  { %v1682_v27 = vadd.f32 1e-05, %v1680_v3 }
0x10c3   :  { %2101 = vrsqrt.f32 %v1682_v27  ;;  %vm1690_vm10 = vweird.f32 %v1682_v27 }
0x10c6   :  { %v1679_v14 = vpop.xlane.xlu0 %1678 }
0x10c7   :  { %v1681_v28 = vmul.f32 %v1679_v14, %v2414_v37 }
0x10c9   :  { %v2102_v29 = vpop.eup %2101  ;;  %v1683_v30 = vadd.f32 1e-05, %v1681_v28 }
0x10ca   :  { %v1685_v31 = vmul.f32 %v2102_v29, %v1682_v27  ;;  %vm1691_vm9 = vweird.f32 %v2102_v29 }
0x10cb   :  { %2103 = vrsqrt.f32 %v1683_v30  ;;  %vm1692_vm11 = vmor %vm1690_vm10, %vm1691_vm9  ;;  %vm1700_vm13 = vweird.f32 %v1683_v30 }
0x10cc   :  { %v1686_v32 = vmul.f32 %v2102_v29, %v1685_v31 }
0x10ce   :  { %v1687_v43 = vmul.f32 0.5, %v1686_v32 }
0x10d0   :  { %v1688_v33 = vsub.f32 1.5, %v1687_v43 }
0x10d1   :  { %v2104_v38 = vpop.eup %2103 }
0x10d2   :  { %v1689_v34 = vmul.f32 %v2102_v29, %v1688_v33  ;;  %v1695_v6 = vmul.f32 %v2104_v38, %v1683_v30  ;;  %vm1701_vm12 = vweird.f32 %v2104_v38 }
0x10d3   :  { %vm1702_vm14 = vmor %vm1700_vm13, %vm1701_vm12 }
0x10d4   :  { %v1693_v49 = vsel %vm1692_vm11, %v2102_v29, %v1689_v34  ;;  %v1696_v44 = vmul.f32 %v2104_v38, %v1695_v6 }
0x10d5   :  { %v1704_v37 = vmul.f32 %v1693_v49, %v1670_v18 }
0x10d6   :  { %v1697_v41 = vmul.f32 0.5, %v1696_v44 }
0x10d7   :  { %v1709_v7 = vmul.f32 %v2013_v39, %v1704_v37 }
0x10d8   :  { %v1698_v42 = vsub.f32 1.5, %v1697_v41 }
0x10d9   :  { %v1714_v45 = vadd.f32 %v2014_v40, %v1709_v7 }
0x10da   :  { %v1699_v46 = vmul.f32 %v2104_v38, %v1698_v42 }
0x10db   :  { %1716 = vst.msk [vmem:[#allocation2] sm:$0xff] %vm112_vm0, %v1714_v45 }
0x10dc   :  { %v1703_v47 = vsel %vm1702_vm14, %v2104_v38, %v1699_v46 }
0x10dd   :  { %v1705_v48 = vmul.f32 %v1703_v47, %v1671_v23 }
0x10df   :  { %v1710_v50 = vmul.f32 %v2013_v39, %v1705_v48 }
0x10e1   :  { %v1715_v51 = vadd.f32 %v2014_v40, %v1710_v50 }
0x10e3   :  { %1717 = vst.msk [vmem:[#allocation2 + $0x8] sm:$0xff] %vm112_vm0, %v1715_v51 }
0x10e4   :  { %1730 = dma.vmem_to_hbm [thread:$0]  %s1723_s1, 256, %s1725_s17, [#allocation3], %s2149_s14, %s2149_s14, %s2754_s26  }
0x10e5   :  { %2131 = dma.done.wait [#allocation3], 256  }
0x10e6   :  { %2132 = vsyncadd [#allocation3], 4294967040 }
0x10e7   :  { %1735 = vsyncpa [#allocation3], 1 }

</bundles_post_ra>
